<compile_context>
chip_gen: v6e
topology: v6e:2x2x1
jax: 0.10.0
libtpu: 0.0.40
codegen_flags: <defaults>
</compile_context>

<pallas_src>
import functools
import jax
import jax.numpy as jnp
from jax import lax
from jax.experimental import pallas as pl
from jax.experimental.pallas import tpu as pltpu

HIDDEN = 100          # nn.LSTM hidden_size in the PyTorch module
HP = 128              # lane-padded hidden size used inside the kernel


def _round_up(x, m):
    return (x + m - 1) // m * m


def lstm_kernel(len_ref, emb_ref, wih_ref, whh_ref, b_ref, wlin_ref, blin_ref,
                out_ref, gx_sc, h_sc, c_sc, hl_sc):
    c_idx = pl.program_id(0)
    bp = h_sc.shape[0]
    hp = h_sc.shape[1]
    tchunk = emb_ref.shape[0] // bp

    @pl.when(c_idx == 0)
    def _():
        h_sc[...] = jnp.zeros_like(h_sc)
        c_sc[...] = jnp.zeros_like(c_sc)
        hl_sc[...] = jnp.zeros_like(hl_sc)

    # Hoisted input projection for the whole time chunk (bias folded in).
    # (TCHUNK*B_pad, D) bf16 x (D, 4*HP) bf16 -> f32 accumulate.
    gx_sc[...] = (jnp.dot(emb_ref[...], wih_ref[...],
                          preferred_element_type=jnp.float32)
                  + b_ref[...])

    lens = len_ref[...]                                    # (B_pad, 1) int32

    def step(t, carry):
        row0 = pl.multiple_of(t * bp, bp)
        gates = (gx_sc[pl.ds(row0, bp), :]
                 + jnp.dot(h_sc[...], whh_ref[...],
                           preferred_element_type=jnp.float32))  # (B_pad, 4*HP)
        # gate order [i, f, o, g]: one wide sigmoid on the leading 3*HP lanes.
        sig_in = gates[:, :3 * hp]
        sig = pl.reciprocal(1.0 + jnp.exp(-sig_in), approx=True)
        i_g = sig[:, 0 * hp:1 * hp]
        f_g = sig[:, 1 * hp:2 * hp]
        o_g = sig[:, 2 * hp:3 * hp]
        g_g = jnp.tanh(gates[:, 3 * hp:4 * hp])
        c_new = f_g * c_sc[...] + i_g * g_g
        h_new = o_g * jnp.tanh(c_new)
        h_sc[...] = h_new
        c_sc[...] = c_new
        # Capture h at the last valid step (t_global == len-1); later steps keep
        # updating h/c unconditionally but their values are never read.
        t_global = c_idx * tchunk + t
        capture = (t_global + 1) == lens                   # (B_pad, 1) bool
        hl_sc[...] = jnp.where(capture, h_new, hl_sc[...])
        return carry

    lax.fori_loop(0, tchunk, step, 0, unroll=True)

    # Final Linear on the captured last-valid hidden states (lane-dense store).
    @pl.when(c_idx == pl.num_programs(0) - 1)
    def _():
        out_ref[...] = (jnp.dot(hl_sc[...], wlin_ref[...],
                                preferred_element_type=jnp.float32)
                        + blin_ref[...]).astype(out_ref.dtype)


def _reorder_ifgo_to_ifog(w):
    """Reorder stacked gate blocks along axis 0 from [i,f,g,o] to [i,f,o,g]."""
    i, f, g, o = jnp.split(w, 4, axis=0)
    return jnp.concatenate([i, f, o, g], axis=0)


def _pad_gate_rows(w, h, hp):
    """Pad the 4 stacked gate blocks along axis 0 from h to hp rows each."""
    parts = jnp.split(w, 4, axis=0)
    pad_cfg = ((0, hp - h),) + ((0, 0),) * (w.ndim - 1)
    return jnp.concatenate([jnp.pad(p, pad_cfg) for p in parts], axis=0)


def init_params(key, vocab, dim, output_size, hidden=HIDDEN):
    ks = jax.random.split(key, 8)
    k = 1.0 / jnp.sqrt(hidden)
    return dict(
        emb_table=jax.random.normal(ks[0], (vocab, dim), jnp.float32),
        w_ih=jax.random.uniform(ks[1], (4 * hidden, dim), jnp.float32, -k, k),
        w_hh=jax.random.uniform(ks[2], (4 * hidden, hidden), jnp.float32, -k, k),
        b_ih=jax.random.uniform(ks[3], (4 * hidden,), jnp.float32, -k, k),
        b_hh=jax.random.uniform(ks[4], (4 * hidden,), jnp.float32, -k, k),
        w_lin=jax.random.uniform(ks[5], (output_size, hidden), jnp.float32, -k, k),
        b_lin=jax.random.uniform(ks[6], (output_size,), jnp.float32, -k, k),
    )


@functools.partial(jax.jit, static_argnames=("output_size", "tchunk"))
def lstm_forward(x, lengths, params, *, output_size, tchunk=4):
    B, T = x.shape
    H = HIDDEN
    D = params["emb_table"].shape[1]

    B_pad = _round_up(B, 8)                    # f32 sublane density
    O_pad = _round_up(output_size, 128)        # lane-dense output stores
    T_pad = _round_up(T, tchunk)
    n_chunks = T_pad // tchunk

    # ---- glue in plain JAX: embedding lookup + padding / transposes ----
    emb = jnp.take(params["emb_table"], x, axis=0)            # (B, T, D)
    emb_tm = jnp.transpose(emb, (1, 0, 2))                    # (T, B, D)
    emb_tm = jnp.pad(emb_tm, ((0, T_pad - T), (0, B_pad - B), (0, 0)))
    emb_flat = emb_tm.reshape(T_pad * B_pad, D).astype(jnp.bfloat16)

    # clamp lengths to T (PyTorch clamps the gather index to max_length-1)
    len_cl = jnp.clip(lengths.astype(jnp.int32), 0, T)
    len2d = jnp.pad(len_cl, (0, B_pad - B))[:, None]          # (B_pad, 1)

    # gate reorder [i,f,g,o] -> [i,f,o,g], pad hidden 100 -> 128 with zeros
    wih = _reorder_ifgo_to_ifog(params["w_ih"])               # (4H, D)
    whh = _reorder_ifgo_to_ifog(params["w_hh"])               # (4H, H)
    bsum = _reorder_ifgo_to_ifog((params["b_ih"] + params["b_hh"])[:, None])

    wih_t = _pad_gate_rows(wih, H, HP).T.astype(jnp.bfloat16)   # (D, 4*HP) bf16
    whh_p = _pad_gate_rows(whh, H, HP)                          # (4*HP, H)
    whh_t = jnp.pad(whh_p, ((0, 0), (0, HP - H))).T             # (HP, 4*HP) f32
    bias = _pad_gate_rows(bsum, H, HP).T                        # (1, 4*HP) f32

    wlin_t = jnp.pad(params["w_lin"],
                     ((0, O_pad - output_size), (0, HP - H))).T  # (HP, O_pad)
    blin = jnp.pad(params["b_lin"], (0, O_pad - output_size))[None, :]  # (1, O_pad)

    const = lambda shape: pl.BlockSpec(shape, lambda c: (0,) * len(shape))

    out_pad = pl.pallas_call(
        lstm_kernel,
        out_shape=jax.ShapeDtypeStruct((B_pad, O_pad), jnp.float32),
        grid=(n_chunks,),
        in_specs=[
            const((B_pad, 1)),                                    # lengths
            pl.BlockSpec((tchunk * B_pad, D), lambda c: (c, 0)),  # emb chunk (pipelined)
            const((D, 4 * HP)),                                   # W_ih^T (bf16)
            const((HP, 4 * HP)),                                  # W_hh^T (f32)
            const((1, 4 * HP)),                                   # b_ih + b_hh
            const((HP, O_pad)),                                   # W_lin^T
            const((1, O_pad)),                                    # b_lin
        ],
        out_specs=const((B_pad, O_pad)),
        scratch_shapes=[
            pltpu.VMEM((tchunk * B_pad, 4 * HP), jnp.float32),    # hoisted gates_x
            pltpu.VMEM((B_pad, HP), jnp.float32),                 # h
            pltpu.VMEM((B_pad, HP), jnp.float32),                 # c
            pltpu.VMEM((B_pad, HP), jnp.float32),                 # h_last
        ],
        compiler_params=pltpu.CompilerParams(
            dimension_semantics=("arbitrary",),                   # serial in time
            vmem_limit_bytes=32 * 1024 * 1024),                   # fits v7x's 64MiB
    )(len2d, emb_flat, wih_t, whh_t, bias, wlin_t, blin)

    # TODO(synk): for large B on v7x, add a leading "parallel" batch grid axis
    # to split the (batch-independent) recurrence across the two TensorCores.
    return out_pad[:B, :output_size]


def reference_forward(x, lengths, params, output_size):
    """Pure-JAX reference mirroring the PyTorch forward."""
    B, T = x.shape
    H = HIDDEN
    emb = jnp.take(params["emb_table"], x, axis=0)             # (B, T, D)
    hi = lax.Precision.HIGHEST
    h = jnp.zeros((B, H), jnp.float32)
    c = jnp.zeros((B, H), jnp.float32)
    bias = params["b_ih"] + params["b_hh"]
    for t in range(T):
        xt = emb[:, t, :]
        gates = (jnp.dot(xt, params["w_ih"].T, precision=hi)
                 + jnp.dot(h, params["w_hh"].T, precision=hi) + bias)
        i_g = jax.nn.sigmoid(gates[:, 0 * H:1 * H])
        f_g = jax.nn.sigmoid(gates[:, 1 * H:2 * H])
        g_g = jnp.tanh(gates[:, 2 * H:3 * H])
        o_g = jax.nn.sigmoid(gates[:, 3 * H:4 * H])
        c_new = f_g * c + i_g * g_g
        h_new = o_g * jnp.tanh(c_new)
        valid = (t < lengths)[:, None]
        h = jnp.where(valid, h_new, h)
        c = jnp.where(valid, c_new, c)
    return jnp.dot(h, params["w_lin"].T, precision=hi) + params["b_lin"]


if __name__ == "__main__":
    key = jax.random.PRNGKey(0)
    k_param, k_tok = jax.random.split(key)

    VOCAB, DIM, OUTPUT_SIZE = 20, 16, 4
    B, T = 2, 8

    params = init_params(k_param, VOCAB, DIM, OUTPUT_SIZE)
    x = jax.random.randint(k_tok, (B, T), 0, VOCAB, dtype=jnp.int32)
    lengths = jnp.array([T, 5], dtype=jnp.int32)

    logits = lstm_forward(x, lengths, params, output_size=OUTPUT_SIZE, tchunk=4)
    jax.block_until_ready(logits)

    ref = reference_forward(x, lengths, params, OUTPUT_SIZE)
    assert logits.shape == (B, OUTPUT_SIZE)
    assert jnp.allclose(logits, ref, atol=1e-2, rtol=1e-2), (logits, ref)
    print("KERNEL_OK")
</pallas_src>

<mosaic_0001>
module attributes {stable_mosaic.version = 11 : i64} {
  func.func @lstm_kernel(%arg0: i32, %arg1: memref<8x1xi32, #tpu.memory_space<vmem>>, %arg2: memref<32x16xbf16, #tpu.memory_space<vmem>>, %arg3: memref<16x512xbf16, #tpu.memory_space<vmem>>, %arg4: memref<128x512xf32, #tpu.memory_space<vmem>>, %arg5: memref<1x512xf32, #tpu.memory_space<vmem>>, %arg6: memref<128x128xf32, #tpu.memory_space<vmem>>, %arg7: memref<1x128xf32, #tpu.memory_space<vmem>>, %arg8: memref<8x128xf32, #tpu.memory_space<vmem>>, %arg9: memref<32x512xf32, #tpu.memory_space<vmem>>, %arg10: memref<8x128xf32, #tpu.memory_space<vmem>>, %arg11: memref<8x128xf32, #tpu.memory_space<vmem>>, %arg12: memref<8x128xf32, #tpu.memory_space<vmem>>) attributes {dimension_semantics = [#tpu.dimension_semantics<arbitrary>], iteration_bounds = array<i64: 2>, scalar_prefetch = 0 : i64, scratch_operands = 4 : i64, tpu.core_type = #tpu.core_type<tc>, window_params = [{pipeline_mode = #tpu.pipeline_mode<synchronous>, transform_indices = @transform_0, window_bounds = array<i64: 8, 1>}, {transform_indices = @transform_1, window_bounds = array<i64: 32, 16>}, {pipeline_mode = #tpu.pipeline_mode<synchronous>, transform_indices = @transform_2, window_bounds = array<i64: 16, 512>}, {pipeline_mode = #tpu.pipeline_mode<synchronous>, transform_indices = @transform_3, window_bounds = array<i64: 128, 512>}, {pipeline_mode = #tpu.pipeline_mode<synchronous>, transform_indices = @transform_4, window_bounds = array<i64: 1, 512>}, {pipeline_mode = #tpu.pipeline_mode<synchronous>, transform_indices = @transform_5, window_bounds = array<i64: 128, 128>}, {pipeline_mode = #tpu.pipeline_mode<synchronous>, transform_indices = @transform_6, window_bounds = array<i64: 1, 128>}, {pipeline_mode = #tpu.pipeline_mode<synchronous>, transform_indices = @transform_7, window_bounds = array<i64: 8, 128>}]} {
    %c0_i32 = arith.constant 0 : i32
    %0 = arith.cmpi eq, %arg0, %c0_i32 : i32
    %1 = arith.extui %0 : i1 to i32
    %c0_i32_0 = arith.constant 0 : i32
    %2 = arith.cmpi ne, %1, %c0_i32_0 : i32
    scf.if %2 {
      %cst_96 = arith.constant 0.000000e+00 : f32
      %166 = vector.broadcast %cst_96 : f32 to vector<8x128xf32>
      %c0_97 = arith.constant 0 : index
      %c0_98 = arith.constant 0 : index
      %167 = vector.load %arg10[%c0_97, %c0_98] : memref<8x128xf32, #tpu.memory_space<vmem>>, vector<8x128xf32>
      tpu.vector_store %arg10[%c0_97, %c0_98], %166 {strides = array<i32>} : memref<8x128xf32, #tpu.memory_space<vmem>>, vector<8x128xf32>,
      %cst_99 = arith.constant 0.000000e+00 : f32
      %168 = vector.broadcast %cst_99 : f32 to vector<8x128xf32>
      %c0_100 = arith.constant 0 : index
      %c0_101 = arith.constant 0 : index
      %169 = vector.load %arg11[%c0_100, %c0_101] : memref<8x128xf32, #tpu.memory_space<vmem>>, vector<8x128xf32>
      tpu.vector_store %arg11[%c0_100, %c0_101], %168 {strides = array<i32>} : memref<8x128xf32, #tpu.memory_space<vmem>>, vector<8x128xf32>,
      %cst_102 = arith.constant 0.000000e+00 : f32
      %170 = vector.broadcast %cst_102 : f32 to vector<8x128xf32>
      %c0_103 = arith.constant 0 : index
      %c0_104 = arith.constant 0 : index
      %171 = vector.load %arg12[%c0_103, %c0_104] : memref<8x128xf32, #tpu.memory_space<vmem>>, vector<8x128xf32>
      tpu.vector_store %arg12[%c0_103, %c0_104], %170 {strides = array<i32>} : memref<8x128xf32, #tpu.memory_space<vmem>>, vector<8x128xf32>,
    } else {
    }
    %c0 = arith.constant 0 : index
    %c0_1 = arith.constant 0 : index
    %3 = vector.load %arg2[%c0, %c0_1] : memref<32x16xbf16, #tpu.memory_space<vmem>>, vector<32x16xbf16>
    %c0_2 = arith.constant 0 : index
    %c0_3 = arith.constant 0 : index
    %4 = vector.load %arg3[%c0_2, %c0_3] : memref<16x512xbf16, #tpu.memory_space<vmem>>, vector<16x512xbf16>
    %cst = arith.constant dense<0.000000e+00> : vector<32x512xf32>
    %5 = tpu.matmul %3, %4, %cst {dimension_numbers = #tpu.dot_dimension_numbers<[1], [0], [0], [1], [0, 0, 1, 1], [], []>} : vector<32x16xbf16>, vector<16x512xbf16>, vector<32x512xf32> -> vector<32x512xf32>
    %c0_4 = arith.constant 0 : index
    %c0_5 = arith.constant 0 : index
    %6 = vector.load %arg5[%c0_4, %c0_5] : memref<1x512xf32, #tpu.memory_space<vmem>>, vector<1x512xf32>
    %7 = vector.broadcast %6 : vector<1x512xf32> to vector<32x512xf32>
    %8 = arith.addf %5, %7 : vector<32x512xf32>
    %c0_6 = arith.constant 0 : index
    %c0_7 = arith.constant 0 : index
    %9 = vector.load %arg9[%c0_6, %c0_7] : memref<32x512xf32, #tpu.memory_space<vmem>>, vector<32x512xf32>
    tpu.vector_store %arg9[%c0_6, %c0_7], %8 {strides = array<i32>} : memref<32x512xf32, #tpu.memory_space<vmem>>, vector<32x512xf32>,
    %c0_8 = arith.constant 0 : index
    %c0_9 = arith.constant 0 : index
    %10 = vector.load %arg1[%c0_8, %c0_9] : memref<8x1xi32, #tpu.memory_space<vmem>>, vector<8x1xi32>
    %c0_i32_10 = arith.constant 0 : i32
    %c8_i32 = arith.constant 8 : i32
    %11 = arith.muli %c0_i32_10, %c8_i32 : i32
    %12 = tpu.assume_multiple %11, 8 : i32
    %13 = arith.index_cast %12 : i32 to index
    %c0_11 = arith.constant 0 : index
    %14 = vector.load %arg9[%13, %c0_11] : memref<32x512xf32, #tpu.memory_space<vmem>>, vector<8x512xf32>
    %c0_12 = arith.constant 0 : index
    %c0_13 = arith.constant 0 : index
    %15 = vector.load %arg10[%c0_12, %c0_13] : memref<8x128xf32, #tpu.memory_space<vmem>>, vector<8x128xf32>
    %c0_14 = arith.constant 0 : index
    %c0_15 = arith.constant 0 : index
    %16 = vector.load %arg4[%c0_14, %c0_15] : memref<128x512xf32, #tpu.memory_space<vmem>>, vector<128x512xf32>
    %cst_16 = arith.constant dense<0.000000e+00> : vector<8x512xf32>
    %17 = tpu.matmul %15, %16, %cst_16 {dimension_numbers = #tpu.dot_dimension_numbers<[1], [0], [0], [1], [0, 0, 1, 1], [], []>} : vector<8x128xf32>, vector<128x512xf32>, vector<8x512xf32> -> vector<8x512xf32>
    %18 = arith.addf %14, %17 : vector<8x512xf32>
    %19 = vector.extract_strided_slice %18 {offsets = [0, 0], sizes = [8, 384], strides = [1, 1]} : vector<8x512xf32> to vector<8x384xf32>
    %cst_17 = arith.constant 0.000000e+00 : f32
    %20 = vector.broadcast %cst_17 : f32 to vector<8x384xf32>
    %21 = arith.subf %20, %19 : vector<8x384xf32>
    %22 = math.exp %21 : vector<8x384xf32>
    %cst_18 = arith.constant 1.000000e+00 : f32
    %23 = vector.broadcast %cst_18 : f32 to vector<8x384xf32>
    %24 = arith.addf %23, %22 : vector<8x384xf32>
    %25 = tpu.reciprocal %24 {approx = true} : vector<8x384xf32> -> vector<8x384xf32>
    %26 = vector.extract_strided_slice %25 {offsets = [0, 0], sizes = [8, 128], strides = [1, 1]} : vector<8x384xf32> to vector<8x128xf32>
    %27 = vector.extract_strided_slice %25 {offsets = [0, 128], sizes = [8, 128], strides = [1, 1]} : vector<8x384xf32> to vector<8x128xf32>
    %28 = vector.extract_strided_slice %25 {offsets = [0, 256], sizes = [8, 128], strides = [1, 1]} : vector<8x384xf32> to vector<8x128xf32>
    %29 = vector.extract_strided_slice %18 {offsets = [0, 384], sizes = [8, 128], strides = [1, 1]} : vector<8x512xf32> to vector<8x128xf32>
    %30 = math.tanh %29 : vector<8x128xf32>
    %c0_19 = arith.constant 0 : index
    %c0_20 = arith.constant 0 : index
    %31 = vector.load %arg11[%c0_19, %c0_20] : memref<8x128xf32, #tpu.memory_space<vmem>>, vector<8x128xf32>
    %32 = arith.mulf %27, %31 : vector<8x128xf32>
    %33 = arith.mulf %26, %30 : vector<8x128xf32>
    %34 = arith.addf %32, %33 : vector<8x128xf32>
    %35 = math.tanh %34 : vector<8x128xf32>
    %36 = arith.mulf %28, %35 : vector<8x128xf32>
    %c0_21 = arith.constant 0 : index
    %c0_22 = arith.constant 0 : index
    %37 = vector.load %arg10[%c0_21, %c0_22] : memref<8x128xf32, #tpu.memory_space<vmem>>, vector<8x128xf32>
    tpu.vector_store %arg10[%c0_21, %c0_22], %36 {strides = array<i32>} : memref<8x128xf32, #tpu.memory_space<vmem>>, vector<8x128xf32>,
    %c0_23 = arith.constant 0 : index
    %c0_24 = arith.constant 0 : index
    %38 = vector.load %arg11[%c0_23, %c0_24] : memref<8x128xf32, #tpu.memory_space<vmem>>, vector<8x128xf32>
    tpu.vector_store %arg11[%c0_23, %c0_24], %34 {strides = array<i32>} : memref<8x128xf32, #tpu.memory_space<vmem>>, vector<8x128xf32>,
    %c4_i32 = arith.constant 4 : i32
    %39 = arith.muli %arg0, %c4_i32 : i32
    %40 = arith.addi %39, %c0_i32_10 : i32
    %c1_i32 = arith.constant 1 : i32
    %41 = arith.addi %40, %c1_i32 : i32
    %42 = vector.broadcast %41 : i32 to vector<8x1xi32>
    %43 = arith.cmpi eq, %42, %10 : vector<8x1xi32>
    %c0_25 = arith.constant 0 : index
    %c0_26 = arith.constant 0 : index
    %44 = vector.load %arg12[%c0_25, %c0_26] : memref<8x128xf32, #tpu.memory_space<vmem>>, vector<8x128xf32>
    %45 = vector.shape_cast %43 : vector<8x1xi1> to vector<8x1xi1>
    %46 = vector.broadcast %45 : vector<8x1xi1> to vector<8x128xi1>
    %47 = arith.select %46, %36, %44 : vector<8x128xi1>, vector<8x128xf32>
    %c0_27 = arith.constant 0 : index
    %c0_28 = arith.constant 0 : index
    %48 = vector.load %arg12[%c0_27, %c0_28] : memref<8x128xf32, #tpu.memory_space<vmem>>, vector<8x128xf32>
    tpu.vector_store %arg12[%c0_27, %c0_28], %47 {strides = array<i32>} : memref<8x128xf32, #tpu.memory_space<vmem>>, vector<8x128xf32>,
    %c1_i32_29 = arith.constant 1 : i32
    %c8_i32_30 = arith.constant 8 : i32
    %49 = arith.muli %c1_i32_29, %c8_i32_30 : i32
    %50 = tpu.assume_multiple %49, 8 : i32
    %51 = arith.index_cast %50 : i32 to index
    %c0_31 = arith.constant 0 : index
    %52 = vector.load %arg9[%51, %c0_31] : memref<32x512xf32, #tpu.memory_space<vmem>>, vector<8x512xf32>
    %c0_32 = arith.constant 0 : index
    %c0_33 = arith.constant 0 : index
    %53 = vector.load %arg10[%c0_32, %c0_33] : memref<8x128xf32, #tpu.memory_space<vmem>>, vector<8x128xf32>
    %c0_34 = arith.constant 0 : index
    %c0_35 = arith.constant 0 : index
    %54 = vector.load %arg4[%c0_34, %c0_35] : memref<128x512xf32, #tpu.memory_space<vmem>>, vector<128x512xf32>
    %cst_36 = arith.constant dense<0.000000e+00> : vector<8x512xf32>
    %55 = tpu.matmul %53, %54, %cst_36 {dimension_numbers = #tpu.dot_dimension_numbers<[1], [0], [0], [1], [0, 0, 1, 1], [], []>} : vector<8x128xf32>, vector<128x512xf32>, vector<8x512xf32> -> vector<8x512xf32>
    %56 = arith.addf %52, %55 : vector<8x512xf32>
    %57 = vector.extract_strided_slice %56 {offsets = [0, 0], sizes = [8, 384], strides = [1, 1]} : vector<8x512xf32> to vector<8x384xf32>
    %cst_37 = arith.constant 0.000000e+00 : f32
    %58 = vector.broadcast %cst_37 : f32 to vector<8x384xf32>
    %59 = arith.subf %58, %57 : vector<8x384xf32>
    %60 = math.exp %59 : vector<8x384xf32>
    %cst_38 = arith.constant 1.000000e+00 : f32
    %61 = vector.broadcast %cst_38 : f32 to vector<8x384xf32>
    %62 = arith.addf %61, %60 : vector<8x384xf32>
    %63 = tpu.reciprocal %62 {approx = true} : vector<8x384xf32> -> vector<8x384xf32>
    %64 = vector.extract_strided_slice %63 {offsets = [0, 0], sizes = [8, 128], strides = [1, 1]} : vector<8x384xf32> to vector<8x128xf32>
    %65 = vector.extract_strided_slice %63 {offsets = [0, 128], sizes = [8, 128], strides = [1, 1]} : vector<8x384xf32> to vector<8x128xf32>
    %66 = vector.extract_strided_slice %63 {offsets = [0, 256], sizes = [8, 128], strides = [1, 1]} : vector<8x384xf32> to vector<8x128xf32>
    %67 = vector.extract_strided_slice %56 {offsets = [0, 384], sizes = [8, 128], strides = [1, 1]} : vector<8x512xf32> to vector<8x128xf32>
    %68 = math.tanh %67 : vector<8x128xf32>
    %c0_39 = arith.constant 0 : index
    %c0_40 = arith.constant 0 : index
    %69 = vector.load %arg11[%c0_39, %c0_40] : memref<8x128xf32, #tpu.memory_space<vmem>>, vector<8x128xf32>
    %70 = arith.mulf %65, %69 : vector<8x128xf32>
    %71 = arith.mulf %64, %68 : vector<8x128xf32>
    %72 = arith.addf %70, %71 : vector<8x128xf32>
    %73 = math.tanh %72 : vector<8x128xf32>
    %74 = arith.mulf %66, %73 : vector<8x128xf32>
    %c0_41 = arith.constant 0 : index
    %c0_42 = arith.constant 0 : index
    %75 = vector.load %arg10[%c0_41, %c0_42] : memref<8x128xf32, #tpu.memory_space<vmem>>, vector<8x128xf32>
    tpu.vector_store %arg10[%c0_41, %c0_42], %74 {strides = array<i32>} : memref<8x128xf32, #tpu.memory_space<vmem>>, vector<8x128xf32>,
    %c0_43 = arith.constant 0 : index
    %c0_44 = arith.constant 0 : index
    %76 = vector.load %arg11[%c0_43, %c0_44] : memref<8x128xf32, #tpu.memory_space<vmem>>, vector<8x128xf32>
    tpu.vector_store %arg11[%c0_43, %c0_44], %72 {strides = array<i32>} : memref<8x128xf32, #tpu.memory_space<vmem>>, vector<8x128xf32>,
    %c4_i32_45 = arith.constant 4 : i32
    %77 = arith.muli %arg0, %c4_i32_45 : i32
    %78 = arith.addi %77, %c1_i32_29 : i32
    %c1_i32_46 = arith.constant 1 : i32
    %79 = arith.addi %78, %c1_i32_46 : i32
    %80 = vector.broadcast %79 : i32 to vector<8x1xi32>
    %81 = arith.cmpi eq, %80, %10 : vector<8x1xi32>
    %c0_47 = arith.constant 0 : index
    %c0_48 = arith.constant 0 : index
    %82 = vector.load %arg12[%c0_47, %c0_48] : memref<8x128xf32, #tpu.memory_space<vmem>>, vector<8x128xf32>
    %83 = vector.shape_cast %81 : vector<8x1xi1> to vector<8x1xi1>
    %84 = vector.broadcast %83 : vector<8x1xi1> to vector<8x128xi1>
    %85 = arith.select %84, %74, %82 : vector<8x128xi1>, vector<8x128xf32>
    %c0_49 = arith.constant 0 : index
    %c0_50 = arith.constant 0 : index
    %86 = vector.load %arg12[%c0_49, %c0_50] : memref<8x128xf32, #tpu.memory_space<vmem>>, vector<8x128xf32>
    tpu.vector_store %arg12[%c0_49, %c0_50], %85 {strides = array<i32>} : memref<8x128xf32, #tpu.memory_space<vmem>>, vector<8x128xf32>,
    %c2_i32 = arith.constant 2 : i32
    %c8_i32_51 = arith.constant 8 : i32
    %87 = arith.muli %c2_i32, %c8_i32_51 : i32
    %88 = tpu.assume_multiple %87, 8 : i32
    %89 = arith.index_cast %88 : i32 to index
    %c0_52 = arith.constant 0 : index
    %90 = vector.load %arg9[%89, %c0_52] : memref<32x512xf32, #tpu.memory_space<vmem>>, vector<8x512xf32>
    %c0_53 = arith.constant 0 : index
    %c0_54 = arith.constant 0 : index
    %91 = vector.load %arg10[%c0_53, %c0_54] : memref<8x128xf32, #tpu.memory_space<vmem>>, vector<8x128xf32>
    %c0_55 = arith.constant 0 : index
    %c0_56 = arith.constant 0 : index
    %92 = vector.load %arg4[%c0_55, %c0_56] : memref<128x512xf32, #tpu.memory_space<vmem>>, vector<128x512xf32>
    %cst_57 = arith.constant dense<0.000000e+00> : vector<8x512xf32>
    %93 = tpu.matmul %91, %92, %cst_57 {dimension_numbers = #tpu.dot_dimension_numbers<[1], [0], [0], [1], [0, 0, 1, 1], [], []>} : vector<8x128xf32>, vector<128x512xf32>, vector<8x512xf32> -> vector<8x512xf32>
    %94 = arith.addf %90, %93 : vector<8x512xf32>
    %95 = vector.extract_strided_slice %94 {offsets = [0, 0], sizes = [8, 384], strides = [1, 1]} : vector<8x512xf32> to vector<8x384xf32>
    %cst_58 = arith.constant 0.000000e+00 : f32
    %96 = vector.broadcast %cst_58 : f32 to vector<8x384xf32>
    %97 = arith.subf %96, %95 : vector<8x384xf32>
    %98 = math.exp %97 : vector<8x384xf32>
    %cst_59 = arith.constant 1.000000e+00 : f32
    %99 = vector.broadcast %cst_59 : f32 to vector<8x384xf32>
    %100 = arith.addf %99, %98 : vector<8x384xf32>
    %101 = tpu.reciprocal %100 {approx = true} : vector<8x384xf32> -> vector<8x384xf32>
    %102 = vector.extract_strided_slice %101 {offsets = [0, 0], sizes = [8, 128], strides = [1, 1]} : vector<8x384xf32> to vector<8x128xf32>
    %103 = vector.extract_strided_slice %101 {offsets = [0, 128], sizes = [8, 128], strides = [1, 1]} : vector<8x384xf32> to vector<8x128xf32>
    %104 = vector.extract_strided_slice %101 {offsets = [0, 256], sizes = [8, 128], strides = [1, 1]} : vector<8x384xf32> to vector<8x128xf32>
    %105 = vector.extract_strided_slice %94 {offsets = [0, 384], sizes = [8, 128], strides = [1, 1]} : vector<8x512xf32> to vector<8x128xf32>
    %106 = math.tanh %105 : vector<8x128xf32>
    %c0_60 = arith.constant 0 : index
    %c0_61 = arith.constant 0 : index
    %107 = vector.load %arg11[%c0_60, %c0_61] : memref<8x128xf32, #tpu.memory_space<vmem>>, vector<8x128xf32>
    %108 = arith.mulf %103, %107 : vector<8x128xf32>
    %109 = arith.mulf %102, %106 : vector<8x128xf32>
    %110 = arith.addf %108, %109 : vector<8x128xf32>
    %111 = math.tanh %110 : vector<8x128xf32>
    %112 = arith.mulf %104, %111 : vector<8x128xf32>
    %c0_62 = arith.constant 0 : index
    %c0_63 = arith.constant 0 : index
    %113 = vector.load %arg10[%c0_62, %c0_63] : memref<8x128xf32, #tpu.memory_space<vmem>>, vector<8x128xf32>
    tpu.vector_store %arg10[%c0_62, %c0_63], %112 {strides = array<i32>} : memref<8x128xf32, #tpu.memory_space<vmem>>, vector<8x128xf32>,
    %c0_64 = arith.constant 0 : index
    %c0_65 = arith.constant 0 : index
    %114 = vector.load %arg11[%c0_64, %c0_65] : memref<8x128xf32, #tpu.memory_space<vmem>>, vector<8x128xf32>
    tpu.vector_store %arg11[%c0_64, %c0_65], %110 {strides = array<i32>} : memref<8x128xf32, #tpu.memory_space<vmem>>, vector<8x128xf32>,
    %c4_i32_66 = arith.constant 4 : i32
    %115 = arith.muli %arg0, %c4_i32_66 : i32
    %116 = arith.addi %115, %c2_i32 : i32
    %c1_i32_67 = arith.constant 1 : i32
    %117 = arith.addi %116, %c1_i32_67 : i32
    %118 = vector.broadcast %117 : i32 to vector<8x1xi32>
    %119 = arith.cmpi eq, %118, %10 : vector<8x1xi32>
    %c0_68 = arith.constant 0 : index
    %c0_69 = arith.constant 0 : index
    %120 = vector.load %arg12[%c0_68, %c0_69] : memref<8x128xf32, #tpu.memory_space<vmem>>, vector<8x128xf32>
    %121 = vector.shape_cast %119 : vector<8x1xi1> to vector<8x1xi1>
    %122 = vector.broadcast %121 : vector<8x1xi1> to vector<8x128xi1>
    %123 = arith.select %122, %112, %120 : vector<8x128xi1>, vector<8x128xf32>
    %c0_70 = arith.constant 0 : index
    %c0_71 = arith.constant 0 : index
    %124 = vector.load %arg12[%c0_70, %c0_71] : memref<8x128xf32, #tpu.memory_space<vmem>>, vector<8x128xf32>
    tpu.vector_store %arg12[%c0_70, %c0_71], %123 {strides = array<i32>} : memref<8x128xf32, #tpu.memory_space<vmem>>, vector<8x128xf32>,
    %c3_i32 = arith.constant 3 : i32
    %c8_i32_72 = arith.constant 8 : i32
    %125 = arith.muli %c3_i32, %c8_i32_72 : i32
    %126 = tpu.assume_multiple %125, 8 : i32
    %127 = arith.index_cast %126 : i32 to index
    %c0_73 = arith.constant 0 : index
    %128 = vector.load %arg9[%127, %c0_73] : memref<32x512xf32, #tpu.memory_space<vmem>>, vector<8x512xf32>
    %c0_74 = arith.constant 0 : index
    %c0_75 = arith.constant 0 : index
    %129 = vector.load %arg10[%c0_74, %c0_75] : memref<8x128xf32, #tpu.memory_space<vmem>>, vector<8x128xf32>
    %c0_76 = arith.constant 0 : index
    %c0_77 = arith.constant 0 : index
    %130 = vector.load %arg4[%c0_76, %c0_77] : memref<128x512xf32, #tpu.memory_space<vmem>>, vector<128x512xf32>
    %cst_78 = arith.constant dense<0.000000e+00> : vector<8x512xf32>
    %131 = tpu.matmul %129, %130, %cst_78 {dimension_numbers = #tpu.dot_dimension_numbers<[1], [0], [0], [1], [0, 0, 1, 1], [], []>} : vector<8x128xf32>, vector<128x512xf32>, vector<8x512xf32> -> vector<8x512xf32>
    %132 = arith.addf %128, %131 : vector<8x512xf32>
    %133 = vector.extract_strided_slice %132 {offsets = [0, 0], sizes = [8, 384], strides = [1, 1]} : vector<8x512xf32> to vector<8x384xf32>
    %cst_79 = arith.constant 0.000000e+00 : f32
    %134 = vector.broadcast %cst_79 : f32 to vector<8x384xf32>
    %135 = arith.subf %134, %133 : vector<8x384xf32>
    %136 = math.exp %135 : vector<8x384xf32>
    %cst_80 = arith.constant 1.000000e+00 : f32
    %137 = vector.broadcast %cst_80 : f32 to vector<8x384xf32>
    %138 = arith.addf %137, %136 : vector<8x384xf32>
    %139 = tpu.reciprocal %138 {approx = true} : vector<8x384xf32> -> vector<8x384xf32>
    %140 = vector.extract_strided_slice %139 {offsets = [0, 0], sizes = [8, 128], strides = [1, 1]} : vector<8x384xf32> to vector<8x128xf32>
    %141 = vector.extract_strided_slice %139 {offsets = [0, 128], sizes = [8, 128], strides = [1, 1]} : vector<8x384xf32> to vector<8x128xf32>
    %142 = vector.extract_strided_slice %139 {offsets = [0, 256], sizes = [8, 128], strides = [1, 1]} : vector<8x384xf32> to vector<8x128xf32>
    %143 = vector.extract_strided_slice %132 {offsets = [0, 384], sizes = [8, 128], strides = [1, 1]} : vector<8x512xf32> to vector<8x128xf32>
    %144 = math.tanh %143 : vector<8x128xf32>
    %c0_81 = arith.constant 0 : index
    %c0_82 = arith.constant 0 : index
    %145 = vector.load %arg11[%c0_81, %c0_82] : memref<8x128xf32, #tpu.memory_space<vmem>>, vector<8x128xf32>
    %146 = arith.mulf %141, %145 : vector<8x128xf32>
    %147 = arith.mulf %140, %144 : vector<8x128xf32>
    %148 = arith.addf %146, %147 : vector<8x128xf32>
    %149 = math.tanh %148 : vector<8x128xf32>
    %150 = arith.mulf %142, %149 : vector<8x128xf32>
    %c0_83 = arith.constant 0 : index
    %c0_84 = arith.constant 0 : index
    %151 = vector.load %arg10[%c0_83, %c0_84] : memref<8x128xf32, #tpu.memory_space<vmem>>, vector<8x128xf32>
    tpu.vector_store %arg10[%c0_83, %c0_84], %150 {strides = array<i32>} : memref<8x128xf32, #tpu.memory_space<vmem>>, vector<8x128xf32>,
    %c0_85 = arith.constant 0 : index
    %c0_86 = arith.constant 0 : index
    %152 = vector.load %arg11[%c0_85, %c0_86] : memref<8x128xf32, #tpu.memory_space<vmem>>, vector<8x128xf32>
    tpu.vector_store %arg11[%c0_85, %c0_86], %148 {strides = array<i32>} : memref<8x128xf32, #tpu.memory_space<vmem>>, vector<8x128xf32>,
    %c4_i32_87 = arith.constant 4 : i32
    %153 = arith.muli %arg0, %c4_i32_87 : i32
    %154 = arith.addi %153, %c3_i32 : i32
    %c1_i32_88 = arith.constant 1 : i32
    %155 = arith.addi %154, %c1_i32_88 : i32
    %156 = vector.broadcast %155 : i32 to vector<8x1xi32>
    %157 = arith.cmpi eq, %156, %10 : vector<8x1xi32>
    %c0_89 = arith.constant 0 : index
    %c0_90 = arith.constant 0 : index
    %158 = vector.load %arg12[%c0_89, %c0_90] : memref<8x128xf32, #tpu.memory_space<vmem>>, vector<8x128xf32>
    %159 = vector.shape_cast %157 : vector<8x1xi1> to vector<8x1xi1>
    %160 = vector.broadcast %159 : vector<8x1xi1> to vector<8x128xi1>
    %161 = arith.select %160, %150, %158 : vector<8x128xi1>, vector<8x128xf32>
    %c0_91 = arith.constant 0 : index
    %c0_92 = arith.constant 0 : index
    %162 = vector.load %arg12[%c0_91, %c0_92] : memref<8x128xf32, #tpu.memory_space<vmem>>, vector<8x128xf32>
    tpu.vector_store %arg12[%c0_91, %c0_92], %161 {strides = array<i32>} : memref<8x128xf32, #tpu.memory_space<vmem>>, vector<8x128xf32>,
    %c4_i32_93 = arith.constant 4 : i32
    %c1_i32_94 = arith.constant 1 : i32
    %163 = arith.cmpi eq, %arg0, %c1_i32_94 : i32
    %164 = arith.extui %163 : i1 to i32
    %c0_i32_95 = arith.constant 0 : i32
    %165 = arith.cmpi ne, %164, %c0_i32_95 : i32
    scf.if %165 {
      %c0_96 = arith.constant 0 : index
      %c0_97 = arith.constant 0 : index
      %166 = vector.load %arg12[%c0_96, %c0_97] : memref<8x128xf32, #tpu.memory_space<vmem>>, vector<8x128xf32>
      %c0_98 = arith.constant 0 : index
      %c0_99 = arith.constant 0 : index
      %167 = vector.load %arg6[%c0_98, %c0_99] : memref<128x128xf32, #tpu.memory_space<vmem>>, vector<128x128xf32>
      %cst_100 = arith.constant dense<0.000000e+00> : vector<8x128xf32>
      %168 = tpu.matmul %166, %167, %cst_100 {dimension_numbers = #tpu.dot_dimension_numbers<[1], [0], [0], [1], [0, 0, 1, 1], [], []>} : vector<8x128xf32>, vector<128x128xf32>, vector<8x128xf32> -> vector<8x128xf32>
      %c0_101 = arith.constant 0 : index
      %c0_102 = arith.constant 0 : index
      %169 = vector.load %arg7[%c0_101, %c0_102] : memref<1x128xf32, #tpu.memory_space<vmem>>, vector<1x128xf32>
      %170 = vector.broadcast %169 : vector<1x128xf32> to vector<8x128xf32>
      %171 = arith.addf %168, %170 : vector<8x128xf32>
      %c0_103 = arith.constant 0 : index
      %c0_104 = arith.constant 0 : index
      %172 = vector.load %arg8[%c0_103, %c0_104] : memref<8x128xf32, #tpu.memory_space<vmem>>, vector<8x128xf32>
      tpu.vector_store %arg8[%c0_103, %c0_104], %171 {strides = array<i32>} : memref<8x128xf32, #tpu.memory_space<vmem>>, vector<8x128xf32>,
    } else {
    }
    return
  }
  func.func @transform_0(%arg0: i32) -> (i32, i32) {
    %c0_i32 = arith.constant 0 : i32
    %c0_i32_0 = arith.constant 0 : i32
    %c0_i32_1 = arith.constant 0 : i32
    return %c0_i32, %c0_i32_0 : i32, i32
  }
  func.func @transform_1(%arg0: i32) -> (i32, i32) {
    %c0_i32 = arith.constant 0 : i32
    %c0_i32_0 = arith.constant 0 : i32
    return %arg0, %c0_i32 : i32, i32
  }
  func.func @transform_2(%arg0: i32) -> (i32, i32) {
    %c0_i32 = arith.constant 0 : i32
    %c0_i32_0 = arith.constant 0 : i32
    %c0_i32_1 = arith.constant 0 : i32
    return %c0_i32, %c0_i32_0 : i32, i32
  }
  func.func @transform_3(%arg0: i32) -> (i32, i32) {
    %c0_i32 = arith.constant 0 : i32
    %c0_i32_0 = arith.constant 0 : i32
    %c0_i32_1 = arith.constant 0 : i32
    return %c0_i32, %c0_i32_0 : i32, i32
  }
  func.func @transform_4(%arg0: i32) -> (i32, i32) {
    %c0_i32 = arith.constant 0 : i32
    %c0_i32_0 = arith.constant 0 : i32
    %c0_i32_1 = arith.constant 0 : i32
    return %c0_i32, %c0_i32_0 : i32, i32
  }
  func.func @transform_5(%arg0: i32) -> (i32, i32) {
    %c0_i32 = arith.constant 0 : i32
    %c0_i32_0 = arith.constant 0 : i32
    %c0_i32_1 = arith.constant 0 : i32
    return %c0_i32, %c0_i32_0 : i32, i32
  }
  func.func @transform_6(%arg0: i32) -> (i32, i32) {
    %c0_i32 = arith.constant 0 : i32
    %c0_i32_0 = arith.constant 0 : i32
    %c0_i32_1 = arith.constant 0 : i32
    return %c0_i32, %c0_i32_0 : i32, i32
  }
  func.func @transform_7(%arg0: i32) -> (i32, i32) {
    %c0_i32 = arith.constant 0 : i32
    %c0_i32_0 = arith.constant 0 : i32
    %c0_i32_1 = arith.constant 0 : i32
    return %c0_i32, %c0_i32_0 : i32, i32
  }
}

</mosaic_0001>

<bundles_post_ra>
// kernel: lstm_forward.1
= control target key start
LH: loop header
LB: loop body
LE: loop exit
PB: predicated region body
PF: predicated region fallthrough
CT: control target
= control target key end

     0   :  { %s1821_s24 = smov 0   ;;  %s2708_s0 = inlined_call_operand.vmem [shape: s32[8,1], index: 0, kind: input, shape index: {}]   ;;  %s2709_s1 = inlined_call_operand.vmem [shape: bf16[64,16], index: 1, kind: input, shape index: {}]   ;;  %s2710_s2 = inlined_call_operand.vmem [shape: bf16[16,512], index: 2, kind: input, shape index: {}]   ;;  %s2711_s3 = inlined_call_operand.vmem [shape: f32[128,512], index: 3, kind: input, shape index: {}]   ;;  %s2712_s4 = inlined_call_operand.vmem [shape: f32[1,512], index: 4, kind: input, shape index: {}]   ;;  %s2713_s5 = inlined_call_operand.vmem [shape: f32[128,128], index: 5, kind: input, shape index: {}]   ;;  %s2714_s6 = inlined_call_operand.vmem [shape: f32[1,128], index: 6, kind: input, shape index: {}]   ;;  %s2715_s7 = inlined_call_operand.vmem [shape: f32[8,128], index: 7, kind: output, shape index: {}]  }
   0x1 LB: > { %s1827_s25 = sadd.s32 4294967295, %s1774_s24   ;;  %p1610_p0 = scmp.ge.s32.totalorder %s1774_s24, 1  ;;  %s1774_s24 = sphi %s1821_s24, %s17_s24  }
   0x2   : > { %p233_p1 = scmp.lt.s32.totalorder %s1774_s24, 3 }
   0x4   : > { %p234_p2 = pnand %p1610_p0, %p233_p1 }
   0x6   : > { %237 = sbr.rel (%p234_p2) target bundleno = 1298 (0x512), region = 48 }
   0xb   : > { %s1832_s26 = sshll.u32 %s1827_s25, 2  ;;  %p1613_p4 = scmp.ne.s32.totalorder %s1827_s25, 0 }
   0xc   : > { %p261_p3 = scmp.lt.s32.totalorder %s1832_s26, 7 }
   0xd   : > { %270 = sbr.rel (%p1613_p4) target bundleno = 21 (0x15), region = 52 }
   0xe   : > { %s262_s27 = scalar_select %p261_p3, %s1832_s26, 7 }
  0x10   : > { %s1612_s28 = sshll.u32 %s262_s27, 2 }
  0x11   : > { %s1839_s8 = scalar_lea.vmem %s2709_s1, %s1612_s28 }
  0x12   : > { %v1776_v0 = vmov 0.0  }
  0x13   : > { %271 = vst [vmem:[#allocation3] sm:$0xff] %v1776_v0  ;;  %272 = vst [vmem:[#allocation4] sm:$0xff] %v1776_v0 }
  0x14   : > { %273 = vst [vmem:[#allocation5] sm:$0xff] %v1776_v0 }
  0x15 PF: > { %v1696_v1 = vld [vmem:[%s2710_s2 + $0x4] ss:$16 sps:$4 sm:$0xff]   ;;  %v1698_v2 = vld [vmem:[%s2710_s2 + $0xc] ss:$16 sps:$4 sm:$0xff]   ;;  %v2716_v3 = vmov 0   ;;  %vm334_vm0 = vcmask 130048  }
  0x16   : > { %373 = vmatprep.mubr.bf16.mxu0 %v2716_v3  ;;  %426 = vmatprep.mubr.bf16.mxu1 %v2716_v3  ;;  %v1700_v4 = vld [vmem:[%s2710_s2] ss:$16 sps:$4 sm:$0xff]   ;;  %v1701_v5 = vld [vmem:[%s2710_s2 + $0x8] ss:$16 sps:$4 sm:$0xff]   ;;  %s707_s27 = sadd.s32 1, %s1832_s26  ;;  %s960_s12 = sadd.s32 2, %s1832_s26 }
  0x17   : > { %355 = vmatprep.subr.bf16.mxu0 %v1696_v1  ;;  %1694 = vset.pattern.permute.xlu0 %v2716_v3  ;;  %v1702_v6 = vld [vmem:[%s1839_s8] sm:$0xff]   ;;  %v1861_v7 = vld [vmem:[%s2711_s3 + $0x1e8] sm:$0xff]  ;;  %v1867_v8 = vld [vmem:[%s2711_s3 + $0x1f8] sm:$0xff]  ;;  %s1213_s15 = sadd.s32 3, %s1832_s26  ;;  %s1466_s23 = sadd.s32 4, %s1832_s26 }
  0x18   : > { %408 = vmatprep.subr.bf16.mxu1 %v1698_v2  ;;  %1695 = vset.pattern.permute.xlu1 %v2716_v3  ;;  %v1874_v9 = vld [vmem:[%s2711_s3 + $0x1e0] sm:$0xff]  ;;  %v1879_v10 = vld [vmem:[%s2711_s3 + $0x1f0] sm:$0xff]  ;;  %v1884_v11 = vld [vmem:[%s2711_s3 + $0x1c8] sm:$0xff]  ;;  %p1625_p5 = scmp.ne.s32.totalorder %s1827_s25, 1 }
  0x19   : > { %356 = vmatpush1.bf16.msra.mxu0 %v1700_v4  ;;  %409 = vmatpush1.bf16.msra.mxu1 %v1701_v5  ;;  %v1889_v12 = vld [vmem:[%s2711_s3 + $0x1d8] sm:$0xff]  ;;  %v1896_v13 = vld [vmem:[%s2711_s3 + $0x1c0] sm:$0xff]  ;;  %v1901_v14 = vld [vmem:[%s2711_s3 + $0x1d0] sm:$0xff]  ;;  %v708_v4 = vstv %s707_s27 }
  0x1a   : > { %536 = vmatprep.subr.mxu0 %v1861_v7  ;;  %607 = vmatprep.subr.mxu1 %v1867_v8  ;;  %v1908_v15 = vld [vmem:[%s2711_s3 + $0x1a8] sm:$0xff]  ;;  %v1913_v16 = vld [vmem:[%s2711_s3 + $0x1b8] sm:$0xff]  ;;  %v1920_v17 = vld [vmem:[%s2711_s3 + $0x1a0] sm:$0xff] }
  0x1b   : > { %v1925_v18 = vld [vmem:[%s2711_s3 + $0x1b0] sm:$0xff]  ;;  %v1932_v19 = vld [vmem:[%s2711_s3 + $0x188] sm:$0xff]  ;;  %v1937_v20 = vld [vmem:[%s2711_s3 + $0x198] sm:$0xff] }
  0x1c   : > { %1620 = vmatmul.mubr.msk.bf16.vlgmr.msra.gmra.mxu0 %vm334_vm0, %v1702_v6  ;;  %1622 = vmatmul.mubr.msk.bf16.vlgmr.msra.gmra.mxu1 %vm334_vm0, %v1702_v6  ;;  %v1944_v21 = vld [vmem:[%s2711_s3 + $0x180] sm:$0xff]  ;;  %v1949_v22 = vld [vmem:[%s2711_s3 + $0x190] sm:$0xff]  ;;  %v1956_v23 = vld [vmem:[%s2711_s3 + $0x168] sm:$0xff] }
  0x1d   : > { %537 = vmatpush1.msra.mxu0 %v1874_v9  ;;  %608 = vmatpush1.msra.mxu1 %v1879_v10  ;;  %v1961_v24 = vld [vmem:[%s2711_s3 + $0x178] sm:$0xff]  ;;  %v1968_v25 = vld [vmem:[%s2711_s3 + $0x160] sm:$0xff]  ;;  %v1973_v26 = vld [vmem:[%s2711_s3 + $0x170] sm:$0xff] }
  0x1e   : > { %538 = vmatprep.subr.mxu0 %v1884_v11  ;;  %609 = vmatprep.subr.mxu1 %v1889_v12  ;;  %v1980_v27 = vld [vmem:[%s2711_s3 + $0x148] sm:$0xff]  ;;  %v1985_v28 = vld [vmem:[%s2711_s3 + $0x158] sm:$0xff]  ;;  %v1992_v29 = vld [vmem:[%s2711_s3 + $0x140] sm:$0xff] }
  0x1f   : > { %539 = vmatpush1.msra.mxu0 %v1896_v13  ;;  %610 = vmatpush1.msra.mxu1 %v1901_v14  ;;  %v1997_v30 = vld [vmem:[%s2711_s3 + $0x150] sm:$0xff]  ;;  %v2004_v31 = vld [vmem:[%s2711_s3 + $0x128] sm:$0xff]  ;;  %v2009_v32 = vld [vmem:[%s2711_s3 + $0x138] sm:$0xff] }
  0x20   : > { %540 = vmatprep.subr.mxu0 %v1908_v15  ;;  %611 = vmatprep.subr.mxu1 %v1913_v16  ;;  %v2016_v33 = vld [vmem:[%s2711_s3 + $0x120] sm:$0xff]  ;;  %v2021_v34 = vld [vmem:[%s2711_s3 + $0x130] sm:$0xff]  ;;  %v2028_v35 = vld [vmem:[%s2711_s3 + $0x108] sm:$0xff] }
  0x21   : > { %541 = vmatpush1.msra.mxu0 %v1920_v17  ;;  %612 = vmatpush1.msra.mxu1 %v1925_v18  ;;  %v2033_v36 = vld [vmem:[%s2711_s3 + $0x118] sm:$0xff]  ;;  %v2040_v37 = vld [vmem:[%s2711_s3 + $0x100] sm:$0xff]  ;;  %v2045_v38 = vld [vmem:[%s2711_s3 + $0x110] sm:$0xff] }
  0x22   : > { %542 = vmatprep.subr.mxu0 %v1932_v19  ;;  %613 = vmatprep.subr.mxu1 %v1937_v20  ;;  %v2052_v39 = vld [vmem:[%s2711_s3 + $0xe8] sm:$0xff]  ;;  %v2057_v40 = vld [vmem:[%s2711_s3 + $0xf8] sm:$0xff]  ;;  %v2064_v41 = vld [vmem:[%s2711_s3 + $0xe0] sm:$0xff] }
  0x23   : > { %543 = vmatpush1.msra.mxu0 %v1944_v21  ;;  %614 = vmatpush1.msra.mxu1 %v1949_v22  ;;  %v1703_v42 = vld [vmem:[%s1839_s8 + $0x8] sm:$0xff]   ;;  %v2072_v43 = vld [vmem:[%s2711_s3 + $0xf0] sm:$0xff]  ;;  %v2084_v45 = vld [vmem:[%s2711_s3 + $0xd8] sm:$0xff] }
  0x24   : > { %544 = vmatprep.subr.mxu0 %v1956_v23  ;;  %615 = vmatprep.subr.mxu1 %v1961_v24  ;;  %v2079_v44 = vld [vmem:[%s2711_s3 + $0xc8] sm:$0xff]  ;;  %v2091_v46 = vld [vmem:[%s2711_s3 + $0xc0] sm:$0xff]  ;;  %v2096_v47 = vld [vmem:[%s2711_s3 + $0xd0] sm:$0xff] }
  0x25   : > { %545 = vmatpush1.msra.mxu0 %v1968_v25  ;;  %616 = vmatpush1.msra.mxu1 %v1973_v26  ;;  %v2103_v48 = vld [vmem:[%s2711_s3 + $0xa8] sm:$0xff]  ;;  %v2108_v49 = vld [vmem:[%s2711_s3 + $0xb8] sm:$0xff]  ;;  %v2115_v50 = vld [vmem:[%s2711_s3 + $0xa0] sm:$0xff] }
  0x26   : > { %546 = vmatprep.subr.mxu0 %v1980_v27  ;;  %617 = vmatprep.subr.mxu1 %v1985_v28  ;;  %2752 = vst [vmem:[#allocation6_spill] sm:$0xff] %v2103_v48  ;;  %2753 = vst [vmem:[#allocation7_spill] sm:$0xff] %v2108_v49  ;;  %v2120_v51 = vld [vmem:[%s2711_s3 + $0xb0] sm:$0xff]  ;;  %v2127_v52 = vld [vmem:[%s2711_s3 + $0x88] sm:$0xff] }
  0x27   : > { %547 = vmatpush1.msra.mxu0 %v1992_v29  ;;  %618 = vmatpush1.msra.mxu1 %v1997_v30  ;;  %2754 = vst [vmem:[#allocation8_spill] sm:$0xff] %v2115_v50  ;;  %2755 = vst [vmem:[#allocation9_spill] sm:$0xff] %v2120_v51  ;;  %v2132_v53 = vld [vmem:[%s2711_s3 + $0x98] sm:$0xff]  ;;  %v2139_v54 = vld [vmem:[%s2711_s3 + $0x80] sm:$0xff] }
  0x28   : > { %548 = vmatprep.subr.mxu0 %v2004_v31  ;;  %619 = vmatprep.subr.mxu1 %v2009_v32  ;;  %2756 = vst [vmem:[#allocation10_spill] sm:$0xff] %v2127_v52  ;;  %2757 = vst [vmem:[#allocation11_spill] sm:$0xff] %v2132_v53  ;;  %v2146_v55 = vld [vmem:[%s2711_s3 + $0x90] sm:$0xff]  ;;  %v2151_v56 = vld [vmem:[%s2711_s3 + $0x68] sm:$0xff] }
  0x29   : > { %549 = vmatpush1.msra.mxu0 %v2016_v33  ;;  %620 = vmatpush1.msra.mxu1 %v2021_v34  ;;  %2758 = vst [vmem:[#allocation12_spill] sm:$0xff] %v2139_v54  ;;  %2759 = vst [vmem:[#allocation13_spill] sm:$0xff] %v2146_v55  ;;  %v2158_v57 = vld [vmem:[%s2711_s3 + $0x78] sm:$0xff]  ;;  %v2165_v58 = vld [vmem:[%s2711_s3 + $0x60] sm:$0xff] }
  0x2a   : > { %550 = vmatprep.subr.mxu0 %v2028_v35  ;;  %621 = vmatprep.subr.mxu1 %v2033_v36  ;;  %2760 = vst [vmem:[#allocation14_spill] sm:$0xff] %v2151_v56  ;;  %2761 = vst [vmem:[#allocation15_spill] sm:$0xff] %v2158_v57  ;;  %v2170_v59 = vld [vmem:[%s2711_s3 + $0x70] sm:$0xff]  ;;  %v2178_v60 = vld [vmem:[%s2711_s3 + $0x48] sm:$0xff] }
  0x2b   : > { %551 = vmatpush1.msra.mxu0 %v2040_v37  ;;  %622 = vmatpush1.msra.mxu1 %v2045_v38  ;;  %2762 = vst [vmem:[#allocation16_spill] sm:$0xff] %v2165_v58  ;;  %2763 = vst [vmem:[#allocation17_spill] sm:$0xff] %v2170_v59  ;;  %v2183_v61 = vld [vmem:[%s2711_s3 + $0x58] sm:$0xff]  ;;  %v2190_v62 = vld [vmem:[%s2711_s3 + $0x40] sm:$0xff] }
  0x2c   : > { %552 = vmatprep.subr.mxu0 %v2052_v39  ;;  %623 = vmatprep.subr.mxu1 %v2057_v40  ;;  %2764 = vst [vmem:[#allocation18_spill] sm:$0xff] %v2178_v60  ;;  %2765 = vst [vmem:[#allocation19_spill] sm:$0xff] %v2183_v61  ;;  %v2195_v63 = vld [vmem:[%s2711_s3 + $0x50] sm:$0xff]  ;;  %v2202_v0 = vld [vmem:[%s2711_s3 + $0x28] sm:$0xff] }
  0x2d   : > { %383 = vmatprep.mubr.bf16.mxu0 %v2716_v3  ;;  %553 = vmatpush1.msra.mxu0 %v2064_v41  ;;  %2766 = vst [vmem:[#allocation20_spill] sm:$0xff] %v2190_v62  ;;  %2767 = vst [vmem:[#allocation21_spill] sm:$0xff] %v2195_v63  ;;  %v2207_v1 = vld [vmem:[%s2711_s3 + $0x38] sm:$0xff]  ;;  %v2212_v2 = vld [vmem:[%s2708_s0] sm:$0xff] }
  0x2e   : > { %624 = vmatpush1.msra.mxu1 %v2072_v43  ;;  %1621 = vmatmul.mubr.msk.bf16.gmra.mxu0 %vm334_vm0, %v1703_v42  ;;  %2768 = vst [vmem:[#allocation22_spill] sm:$0xff] %v2202_v0  ;;  %2769 = vst [vmem:[#allocation23_spill] sm:$0xff] %v2207_v1  ;;  %v2219_v5 = vld [vmem:[%s2711_s3 + $0x20] sm:$0xff]  ;;  %v2224_v6 = vld [vmem:[%s2711_s3 + $0x30] sm:$0xff]  ;;  %vm709_vm1 = vcmp.eq.s32.totalorder %v708_v4, %v2212_v2  ;;  %v2777_v4 = vmov 0  }
  0x2f   : > { %554 = vmatprep.subr.mxu0 %v2079_v44  ;;  %625 = vmatprep.subr.mxu1 %v2084_v45  ;;  %2770 = vst [vmem:[#allocation24_spill] sm:$0xff] %v2212_v2  ;;  %2771 = vst [vmem:[#allocation25_spill] sm:$0xff] %v2219_v5  ;;  %v711_v2 = vsel %vm709_vm1, 1, %v2777_v4 }
  0x30   : > { %555 = vmatpush1.msra.mxu0 %v2091_v46  ;;  %626 = vmatpush1.msra.mxu1 %v2096_v47  ;;  %2772 = vst [vmem:[#allocation26_spill] sm:$0xff] %v2224_v6 }
  0x31   : > { %556 = vmatprep.subr.mxu0 %v2103_v48  ;;  %627 = vmatprep.subr.mxu1 %v2108_v49 }
  0x32   : > { %557 = vmatpush1.msra.mxu0 %v2115_v50  ;;  %628 = vmatpush1.msra.mxu1 %v2120_v51 }
  0x33   : > { %558 = vmatprep.subr.mxu0 %v2127_v52  ;;  %629 = vmatprep.subr.mxu1 %v2132_v53 }
  0x34   : > { %436 = vmatprep.mubr.bf16.mxu1 %v2716_v3  ;;  %559 = vmatpush1.msra.mxu0 %v2139_v54  ;;  %v2236_v3 = vld [vmem:[%s2711_s3 + $0x18] sm:$0xff] }
  0x35   : > { %630 = vmatpush1.msra.mxu1 %v2146_v55  ;;  %560 = vmatprep.subr.mxu0 %v2151_v56  ;;  %2774 = vst [vmem:[#allocation28_spill] sm:$0xff] %v2236_v3 }
  0x36   : > { %1623 = vmatmul.mubr.msk.bf16.gmra.mxu1 %vm334_vm0, %v1703_v42  ;;  %631 = vmatprep.subr.mxu1 %v2158_v57  ;;  %v2231_v42 = vld [vmem:[%s2711_s3 + $0x8] sm:$0xff] }
  0x37   : > { %561 = vmatpush1.msra.mxu0 %v2165_v58  ;;  %632 = vmatpush1.msra.mxu1 %v2170_v59  ;;  %2773 = vst [vmem:[#allocation27_spill] sm:$0xff] %v2231_v42 }
  0x38   : > { %562 = vmatprep.subr.mxu0 %v2178_v60  ;;  %633 = vmatprep.subr.mxu1 %v2183_v61 }
  0x39   : > { %563 = vmatpush1.msra.mxu0 %v2190_v62  ;;  %634 = vmatpush1.msra.mxu1 %v2195_v63  ;;  %v2243_v62 = vld [vmem:[%s2711_s3] sm:$0xff]  ;;  %v2251_v63 = vld [vmem:[%s2711_s3 + $0x10] sm:$0xff] }
  0x3a   : > { %564 = vmatprep.subr.mxu0 %v2202_v0  ;;  %635 = vmatprep.subr.mxu1 %v2207_v1  ;;  %2775 = vst [vmem:[#allocation29_spill] sm:$0xff] %v2243_v62  ;;  %2776 = vst [vmem:[#allocation30_spill] sm:$0xff] %v2251_v63  ;;  %v471_v1 = vld [vmem:[#allocation3] sm:$0xff]  ;;  %v2728_v0 = vmov 0.0  }
  0x3b   : > { %565 = vmatpush1.msra.mxu0 %v2219_v5  ;;  %636 = vmatpush1.msra.mxu1 %v2224_v6 }
  0x3c   : > { %566 = vmatprep.subr.mxu0 %v2231_v42  ;;  %637 = vmatprep.subr.mxu1 %v2236_v3 }
  0x3d   : > { %567 = vmatpush1.msra.mxu0 %v2243_v62  ;;  %600 = vmatprep.mubr.f32.mxu0 %v2728_v0 }
  0x3e   : > { %638 = vmatpush1.msra.mxu1 %v2251_v63  ;;  %671 = vmatprep.mubr.f32.mxu1 %v2728_v0  ;;  %v2780_v0 = vld [vmem:[#allocation22_spill] sm:$0xff] }
  0x3f   : > { %601 = vmatmul.mubr.f32.vlgmr.msra.gmra.mxu0 %v471_v1  ;;  %672 = vmatmul.mubr.f32.vlgmr.msra.gmra.mxu1 %v471_v1  ;;  %v2778_v1 = vld [vmem:[#allocation20_spill] sm:$0xff] }
  0x40   : > { %713 = vperm.xlu0 %1694, %v711_v2   ;;  %790 = vmatprep.subr.mxu0 %v1861_v7  ;;  %v2779_v2 = vld [vmem:[#allocation21_spill] sm:$0xff] }
  0x41   : > { %861 = vmatprep.subr.mxu1 %v1867_v8  ;;  %791 = vmatpush1.msra.mxu0 %v1874_v9 }
  0x42   : > { %862 = vmatpush1.msra.mxu1 %v1879_v10  ;;  %792 = vmatprep.subr.mxu0 %v1884_v11 }
  0x43   : > { %863 = vmatprep.subr.mxu1 %v1889_v12  ;;  %793 = vmatpush1.msra.mxu0 %v1896_v13 }
  0x44   : > { %864 = vmatpush1.msra.mxu1 %v1901_v14  ;;  %794 = vmatprep.subr.mxu0 %v1908_v15 }
  0x45   : > { %865 = vmatprep.subr.mxu1 %v1913_v16  ;;  %795 = vmatpush1.msra.mxu0 %v1920_v17 }
  0x46   : > { %866 = vmatpush1.msra.mxu1 %v1925_v18  ;;  %796 = vmatprep.subr.mxu0 %v1932_v19 }
  0x47   : > { %867 = vmatprep.subr.mxu1 %v1937_v20  ;;  %797 = vmatpush1.msra.mxu0 %v1944_v21 }
  0x48   : > { %868 = vmatpush1.msra.mxu1 %v1949_v22  ;;  %798 = vmatprep.subr.mxu0 %v1956_v23 }
  0x49   : > { %869 = vmatprep.subr.mxu1 %v1961_v24  ;;  %799 = vmatpush1.msra.mxu0 %v1968_v25 }
  0x4a   : > { %870 = vmatpush1.msra.mxu1 %v1973_v26  ;;  %800 = vmatprep.subr.mxu0 %v1980_v27 }
  0x4b   : > { %871 = vmatprep.subr.mxu1 %v1985_v28  ;;  %801 = vmatpush1.msra.mxu0 %v1992_v29 }
  0x4c   : > { %872 = vmatpush1.msra.mxu1 %v1997_v30  ;;  %802 = vmatprep.subr.mxu0 %v2004_v31 }
  0x4d   : > { %873 = vmatprep.subr.mxu1 %v2009_v32  ;;  %803 = vmatpush1.msra.mxu0 %v2016_v33 }
  0x4e   : > { %874 = vmatpush1.msra.mxu1 %v2021_v34  ;;  %804 = vmatprep.subr.mxu0 %v2028_v35 }
  0x4f   : > { %875 = vmatprep.subr.mxu1 %v2033_v36  ;;  %805 = vmatpush1.msra.mxu0 %v2040_v37 }
  0x50   : > { %876 = vmatpush1.msra.mxu1 %v2045_v38  ;;  %806 = vmatprep.subr.mxu0 %v2052_v39 }
  0x51   : > { %877 = vmatprep.subr.mxu1 %v2057_v40  ;;  %807 = vmatpush1.msra.mxu0 %v2064_v41 }
  0x52   : > { %878 = vmatpush1.msra.mxu1 %v2072_v43  ;;  %808 = vmatprep.subr.mxu0 %v2079_v44 }
  0x53   : > { %879 = vmatprep.subr.mxu1 %v2084_v45  ;;  %809 = vmatpush1.msra.mxu0 %v2091_v46 }
  0x54   : > { %880 = vmatpush1.msra.mxu1 %v2096_v47  ;;  %810 = vmatprep.subr.mxu0 %v2103_v48 }
  0x55   : > { %881 = vmatprep.subr.mxu1 %v2108_v49  ;;  %811 = vmatpush1.msra.mxu0 %v2115_v50 }
  0x56   : > { %882 = vmatpush1.msra.mxu1 %v2120_v51  ;;  %812 = vmatprep.subr.mxu0 %v2127_v52 }
  0x57   : > { %883 = vmatprep.subr.mxu1 %v2132_v53  ;;  %813 = vmatpush1.msra.mxu0 %v2139_v54 }
  0x58   : > { %884 = vmatpush1.msra.mxu1 %v2146_v55  ;;  %814 = vmatprep.subr.mxu0 %v2151_v56  ;;  %v2781_v55 = vld [vmem:[#allocation23_spill] sm:$0xff] }
  0x59   : > { %885 = vmatprep.subr.mxu1 %v2158_v57  ;;  %815 = vmatpush1.msra.mxu0 %v2165_v58 }
  0x5a   : > { %886 = vmatpush1.msra.mxu1 %v2170_v59  ;;  %816 = vmatprep.subr.mxu0 %v2178_v60  ;;  %v2782_v60 = vmov 0.0  }
  0x5b   : > { %887 = vmatprep.subr.mxu1 %v2183_v61  ;;  %817 = vmatpush1.msra.mxu0 %v2778_v1 }
  0x5c   : > { %888 = vmatpush1.msra.mxu1 %v2779_v2  ;;  %818 = vmatprep.subr.mxu0 %v2780_v0 }
  0x5d   : > { %889 = vmatprep.subr.mxu1 %v2781_v55  ;;  %819 = vmatpush1.msra.mxu0 %v2219_v5  ;;  %v961_v5 = vstv %s960_s12  ;;  %v2783_v55 = vld [vmem:[#allocation24_spill] sm:$0xff] }
  0x5e   : > { %890 = vmatpush1.msra.mxu1 %v2224_v6  ;;  %820 = vmatprep.subr.mxu0 %v2231_v42  ;;  %vm962_vm2 = vcmp.eq.s32.totalorder %v961_v5, %v2783_v55 }
  0x5f   : > { %891 = vmatprep.subr.mxu1 %v2236_v3  ;;  %821 = vmatpush1.msra.mxu0 %v2243_v62  ;;  %v964_v42 = vsel %vm962_vm2, 1, %v2777_v4  ;;  %v284_v3 = vlaneseq }
  0x60   : > { %854 = vmatprep.mubr.f32.mxu0 %v2782_v60  ;;  %892 = vmatpush1.msra.mxu1 %v2251_v63  ;;  %v282_v63 = vld [vmem:[%s2712_s4] sm:$0xf] }
  0x61   : > { %925 = vmatprep.mubr.f32.mxu1 %v2782_v60  ;;  %1043 = vmatprep.subr.mxu0 %v1861_v7  ;;  %v285_v6 = vshrl.u32 %v284_v3, 7 }
  0x62   : > { %1114 = vmatprep.subr.mxu1 %v1867_v8  ;;  %966 = vperm.xlu0 %1694, %v964_v42  }
  0x63   : > { %v294_v62 = vsub.s32 2, %v285_v6  ;;  %v286_v0 = vsub.s32 0, %v285_v6  ;;  %v298_v2 = vsub.s32 3, %v285_v6  ;;  %v290_v1 = vsub.s32 1, %v285_v6 }
  0x65   : > { %v295_v8 = vrot.slane %v282_v63, %v294_v62  ;;  %v287_v58 = vrot.slane %v282_v63, %v286_v0  ;;  %v299_v5 = vrot.slane %v282_v63, %v298_v2  ;;  %v291_v42 = vrot.slane %v282_v63, %v290_v1 }
  0xdc   : > { %v375_v60 = vpop.f32.mrf.mxu0  ;;  %v428_v7 = vpop.f32.mrf.mxu1 }
  0xde   : > { %v377_v61 = vpop.f32.mrf.mxu0  ;;  %v430_v59 = vpop.f32.mrf.mxu1 }
  0xdf   : > { %v431_v48 = vadd.f32 %v430_v59, %v299_v5 }
  0xe0   : > { %v379_v55 = vpop.f32.mrf.mxu0  ;;  %v432_v4 = vpop.f32.mrf.mxu1 }
  0xe1   : > { %v2334_v57 = vadd.f32 %v379_v55, %v287_v58  ;;  %v2336_v3 = vadd.f32 %v432_v4, %v295_v8 }
  0xe2   : > { %v381_v56 = vpop.f32.mrf.mxu0  ;;  %v434_v54 = vpop.f32.mrf.mxu1 }
  0xe3   : > { %2784 = vst [vmem:[#allocation31_spill] sm:$0xff] %v2334_v57  ;;  %2785 = vst [vmem:[#allocation32_spill] sm:$0xff] %v2336_v3  ;;  %v2338_v53 = vadd.f32 %v381_v56, %v291_v42  ;;  %v2340_v52 = vadd.f32 %v434_v54, %v299_v5 }
  0xe5   : > { %2786 = vst [vmem:[#allocation33_spill] sm:$0xff] %v2338_v53  ;;  %2787 = vst [vmem:[#allocation34_spill] sm:$0xff] %v2340_v52  ;;  %v378_v53 = vadd.f32 %v377_v61, %v291_v42 }
  0xee   : > { %v385_v51 = vpop.f32.mrf.mxu0 }
  0xef   : > { %v2342_v6 = vadd.f32 %v385_v51, %v287_v58 }
  0xf0   : > { %v387_v62 = vpop.f32.mrf.mxu0 }
  0xf1   : > { %2788 = vst [vmem:[#allocation35_spill] sm:$0xff] %v2342_v6  ;;  %v2344_v50 = vadd.f32 %v387_v62, %v291_v42  ;;  %v376_v62 = vadd.f32 %v375_v60, %v287_v58 }
  0xf2   : > { %v389_v0 = vpop.f32.mrf.mxu0 }
  0xf3   : > { %2789 = vst [vmem:[#allocation36_spill] sm:$0xff] %v2344_v50  ;;  %v2346_v2 = vadd.f32 %v389_v0, %v287_v58 }
  0xf4   : > { %v391_v63 = vpop.f32.mrf.mxu0 }
  0xf5   : > { %2790 = vst [vmem:[#allocation37_spill] sm:$0xff] %v2346_v2  ;;  %v2348_v55 = vadd.f32 %v391_v63, %v291_v42  ;;  %v698_v42 = vld [vmem:[#allocation4] sm:$0xff] }
  0xf6   : > { %v438_v4 = vpop.f32.mrf.mxu1 }
  0xf7   : > { %2791 = vst [vmem:[#allocation38_spill] sm:$0xff] %v2348_v55  ;;  %v2350_v1 = vadd.f32 %v438_v4, %v295_v8 }
  0xf8   : > { %v440_v3 = vpop.f32.mrf.mxu1 }
  0xf9   : > { %2792 = vst [vmem:[#allocation39_spill] sm:$0xff] %v2350_v1  ;;  %v2352_v56 = vadd.f32 %v440_v3, %v299_v5  ;;  %v429_v3 = vadd.f32 %v428_v7, %v295_v8 }
  0xfa   : > { %v442_v54 = vpop.f32.mrf.mxu1 }
  0xfb   : > { %2793 = vst [vmem:[#allocation40_spill] sm:$0xff] %v2352_v56  ;;  %v2354_v52 = vadd.f32 %v442_v54, %v295_v8 }
  0xfc   : > { %v444_v51 = vpop.f32.mrf.mxu1 }
  0xfd   : > { %2794 = vst [vmem:[#allocation41_spill] sm:$0xff] %v2354_v52  ;;  %v2356_v6 = vadd.f32 %v444_v51, %v299_v5 }
  0xff   : > { %2795 = vst [vmem:[#allocation42_spill] sm:$0xff] %v2356_v6  ;;  %v602_v50 = vpop.f32.mrf.mxu0  ;;  %v673_v4 = vpop.f32.mrf.mxu1 }
 0x100   : > { %v678_v0 = vadd.f32 %v602_v50, %v376_v62  ;;  %v680_v56 = vadd.f32 %v673_v4, %v429_v3  ;;  %v2826_v4 = vld [vmem:[#allocation34_spill] sm:$0xff] }
 0x101   : > { %v604_v2 = vpop.f32.mrf.mxu0  ;;  %v675_v52 = vpop.f32.mrf.mxu1 }
 0x102   : > { %v682_v57 = vsub.f32 0.0, %v678_v0  ;;  %v679_v63 = vadd.f32 %v604_v2, %v378_v53  ;;  %v684_v54 = vsub.f32 0.0, %v680_v56  ;;  %v681_v58 = vadd.f32 %v675_v52, %v431_v48  ;;  %v2825_v56 = vld [vmem:[#allocation32_spill] sm:$0xff] }
 0x104   : > { %v685_v55 = vmul.f32 1.442695, %v682_v57  ;;  %v683_v49 = vsub.f32 0.0, %v679_v63  ;;  %v689_v51 = vmul.f32 1.442695, %v684_v54 }
 0x106   : > { %1704 = vpow2.f32 %v685_v55  ;;  %v687_v1 = vmul.f32 1.442695, %v683_v49 }
 0x108   : > { %1706 = vpow2.f32 %v687_v1 }
 0x109   : > { %1708 = vpow2.f32 %v689_v51 }
 0x113   : > { %v1705_v6 = vpop.eup %1704 }
 0x114   : > { %v691_v60 = vadd.f32 1.0, %v1705_v6 }
 0x115   : > { %v1707_v61 = vpop.eup %1706 }
 0x116   : > { %1710 = vrcp.f32 %v691_v60  ;;  %v692_v50 = vadd.f32 1.0, %v1707_v61  ;;  %v1709_v53 = vpop.eup %1708 }
 0x117   : > { %1712 = vtanh.f32 %v681_v58  ;;  %v693_v8 = vadd.f32 1.0, %v1709_v53 }
 0x118   : > { %1714 = vrcp.f32 %v692_v50 }
 0x119   : > { %1716 = vrcp.f32 %v693_v8 }
 0x123   : > { %v1711_v57 = vpop.eup %1710 }
 0x124   : > { %v1713_v49 = vpop.eup %1712 }
 0x125   : > { %v1715_v7 = vpop.eup %1714  ;;  %v700_v55 = vmul.f32 %v1713_v49, %v1711_v57 }
 0x126   : > { %v699_v2 = vmul.f32 %v1715_v7, %v698_v42  ;;  %v1717_v48 = vpop.eup %1716 }
 0x128   : > { %v2358_v1 = vadd.f32 %v700_v55, %v699_v2  ;;  %v714_v55 = vpop.permute.xlu0 %713 }
 0x129   : > { %vm715_vm4 = vcmp.eq.s32.totalorder %v714_v55, 1  ;;  %v1243_v55 = vld [vmem:[%s2711_s3 + $0x58] sm:$0xff] }
 0x12a   : > { %1718 = vtanh.f32 %v2358_v1 }
 0x137   : > { %v1719_v52 = vpop.eup %1718 }
 0x138   : > { %v2361_v59 = vmul.f32 %v1719_v52, %v1717_v48  ;;  %v967_v48 = vpop.permute.xlu0 %966 }
 0x139   : > { %vm968_vm5 = vcmp.eq.s32.totalorder %v967_v48, 1  ;;  %v1240_v48 = vld [vmem:[%s2711_s3 + $0x40] sm:$0xff] }
 0x13a   : > { %855 = vmatmul.mubr.f32.vlgmr.msra.gmra.mxu0 %v2361_v59  ;;  %926 = vmatmul.mubr.f32.vlgmr.msra.gmra.mxu1 %v2361_v59 }
 0x13b   : > { %1044 = vmatpush1.msra.mxu0 %v1874_v9  ;;  %1115 = vmatpush1.msra.mxu1 %v1879_v10  ;;  %v2796_v9 = vld [vmem:[#allocation6_spill] sm:$0xff]  ;;  %v2797_v10 = vld [vmem:[#allocation7_spill] sm:$0xff] }
 0x13c   : > { %1045 = vmatprep.subr.mxu0 %v1884_v11  ;;  %1116 = vmatprep.subr.mxu1 %v1889_v12  ;;  %v2798_v11 = vld [vmem:[#allocation8_spill] sm:$0xff]  ;;  %v2799_v12 = vld [vmem:[#allocation9_spill] sm:$0xff] }
 0x13d   : > { %1046 = vmatpush1.msra.mxu0 %v1896_v13  ;;  %1117 = vmatpush1.msra.mxu1 %v1901_v14  ;;  %v2800_v13 = vld [vmem:[#allocation10_spill] sm:$0xff]  ;;  %v2801_v14 = vld [vmem:[#allocation11_spill] sm:$0xff] }
 0x13e   : > { %1047 = vmatprep.subr.mxu0 %v1908_v15  ;;  %1118 = vmatprep.subr.mxu1 %v1913_v16  ;;  %v2802_v15 = vld [vmem:[#allocation12_spill] sm:$0xff]  ;;  %v2803_v16 = vld [vmem:[#allocation13_spill] sm:$0xff] }
 0x13f   : > { %1048 = vmatpush1.msra.mxu0 %v1920_v17  ;;  %1119 = vmatpush1.msra.mxu1 %v1925_v18  ;;  %v2804_v17 = vld [vmem:[#allocation14_spill] sm:$0xff]  ;;  %v2805_v18 = vld [vmem:[#allocation15_spill] sm:$0xff] }
 0x140   : > { %1049 = vmatprep.subr.mxu0 %v1932_v19  ;;  %1120 = vmatprep.subr.mxu1 %v1937_v20  ;;  %v2806_v19 = vld [vmem:[#allocation16_spill] sm:$0xff]  ;;  %v2807_v20 = vld [vmem:[#allocation17_spill] sm:$0xff] }
 0x141   : > { %1050 = vmatpush1.msra.mxu0 %v1944_v21  ;;  %1121 = vmatpush1.msra.mxu1 %v1949_v22  ;;  %v2808_v21 = vld [vmem:[#allocation18_spill] sm:$0xff]  ;;  %v2809_v22 = vld [vmem:[#allocation19_spill] sm:$0xff] }
 0x142   : > { %1051 = vmatprep.subr.mxu0 %v1956_v23  ;;  %1122 = vmatprep.subr.mxu1 %v1961_v24  ;;  %v2810_v23 = vld [vmem:[#allocation20_spill] sm:$0xff]  ;;  %v2811_v24 = vld [vmem:[#allocation21_spill] sm:$0xff] }
 0x143   : > { %1052 = vmatpush1.msra.mxu0 %v1968_v25  ;;  %1123 = vmatpush1.msra.mxu1 %v1973_v26  ;;  %v2812_v25 = vld [vmem:[#allocation22_spill] sm:$0xff]  ;;  %v2813_v26 = vld [vmem:[#allocation23_spill] sm:$0xff] }
 0x144   : > { %1053 = vmatprep.subr.mxu0 %v1980_v27  ;;  %1124 = vmatprep.subr.mxu1 %v1985_v28  ;;  %v2814_v27 = vld [vmem:[#allocation25_spill] sm:$0xff]  ;;  %v2815_v28 = vld [vmem:[#allocation26_spill] sm:$0xff] }
 0x145   : > { %1054 = vmatpush1.msra.mxu0 %v1992_v29  ;;  %1125 = vmatpush1.msra.mxu1 %v1997_v30  ;;  %v2816_v29 = vld [vmem:[#allocation27_spill] sm:$0xff]  ;;  %v2817_v30 = vld [vmem:[#allocation28_spill] sm:$0xff] }
 0x146   : > { %1055 = vmatprep.subr.mxu0 %v2004_v31  ;;  %1126 = vmatprep.subr.mxu1 %v2009_v32  ;;  %v2818_v31 = vld [vmem:[#allocation29_spill] sm:$0xff]  ;;  %v2819_v32 = vmov 0.0  }
 0x147   : > { %1056 = vmatpush1.msra.mxu0 %v2016_v33  ;;  %1127 = vmatpush1.msra.mxu1 %v2021_v34  ;;  %v2820_v33 = vld [vmem:[#allocation30_spill] sm:$0xff]  ;;  %v1214_v34 = vstv %s1213_s15 }
 0x148   : > { %1057 = vmatprep.subr.mxu0 %v2028_v35  ;;  %1128 = vmatprep.subr.mxu1 %v2033_v36  ;;  %v2821_v35 = vld [vmem:[#allocation24_spill] sm:$0xff]  ;;  %v2822_v36 = vmov 0  }
 0x149   : > { %1058 = vmatpush1.msra.mxu0 %v2040_v37  ;;  %1129 = vmatpush1.msra.mxu1 %v2045_v38  ;;  %vm1215_vm3 = vcmp.eq.s32.totalorder %v1214_v34, %v2821_v35  ;;  %v1272_v34 = vld [vmem:[%s2711_s3 + $0x140] sm:$0xff] }
 0x14a   : > { %1059 = vmatprep.subr.mxu0 %v2052_v39  ;;  %1130 = vmatprep.subr.mxu1 %v2057_v40  ;;  %v1217_v37 = vsel %vm1215_vm3, 1, %v2822_v36  ;;  %v2823_v39 = vld [vmem:[#allocation31_spill] sm:$0xff] }
 0x14b   : > { %1060 = vmatpush1.msra.mxu0 %v2064_v41  ;;  %1131 = vmatpush1.msra.mxu1 %v2072_v43 }
 0x14c   : > { %1061 = vmatprep.subr.mxu0 %v2079_v44  ;;  %1132 = vmatprep.subr.mxu1 %v2084_v45  ;;  %v2824_v44 = vld [vmem:[#allocation33_spill] sm:$0xff] }
 0x14d   : > { %1062 = vmatpush1.msra.mxu0 %v2091_v46  ;;  %1133 = vmatpush1.msra.mxu1 %v2096_v47 }
 0x14e   : > { %1063 = vmatprep.subr.mxu0 %v2796_v9  ;;  %1134 = vmatprep.subr.mxu1 %v2797_v10  ;;  %v710_v9 = vld [vmem:[#allocation5] sm:$0xff] }
 0x14f   : > { %1064 = vmatpush1.msra.mxu0 %v2798_v11  ;;  %1135 = vmatpush1.msra.mxu1 %v2799_v12  ;;  %v716_v12 = vsel %vm715_vm4, %v2361_v59, %v710_v9  ;;  %v1292_v59 = vld [vmem:[%s2711_s3 + $0x1e0] sm:$0xff]  ;;  %v1237_v9 = vld [vmem:[%s2711_s3 + $0x28] sm:$0xff] }
 0x150   : > { %1065 = vmatprep.subr.mxu0 %v2800_v13  ;;  %1136 = vmatprep.subr.mxu1 %v2801_v14  ;;  %v1295_v14 = vld [vmem:[%s2711_s3 + $0x1f8] sm:$0xff] }
 0x151   : > { %1066 = vmatpush1.msra.mxu0 %v2802_v15  ;;  %1137 = vmatpush1.msra.mxu1 %v2803_v16  ;;  %v1294_v15 = vld [vmem:[%s2711_s3 + $0x1f0] sm:$0xff]  ;;  %v1289_v16 = vld [vmem:[%s2711_s3 + $0x1c8] sm:$0xff] }
 0x152   : > { %1067 = vmatprep.subr.mxu0 %v2804_v17  ;;  %1138 = vmatprep.subr.mxu1 %v2805_v18  ;;  %v1291_v17 = vld [vmem:[%s2711_s3 + $0x1d8] sm:$0xff]  ;;  %v1288_v18 = vld [vmem:[%s2711_s3 + $0x1c0] sm:$0xff] }
 0x153   : > { %1068 = vmatpush1.msra.mxu0 %v2806_v19  ;;  %1139 = vmatpush1.msra.mxu1 %v2807_v20  ;;  %v1290_v19 = vld [vmem:[%s2711_s3 + $0x1d0] sm:$0xff]  ;;  %v1285_v20 = vld [vmem:[%s2711_s3 + $0x1a8] sm:$0xff] }
 0x154   : > { %1069 = vmatprep.subr.mxu0 %v2808_v21  ;;  %1140 = vmatprep.subr.mxu1 %v2809_v22  ;;  %v1287_v21 = vld [vmem:[%s2711_s3 + $0x1b8] sm:$0xff]  ;;  %v1284_v22 = vld [vmem:[%s2711_s3 + $0x1a0] sm:$0xff] }
 0x155   : > { %1070 = vmatpush1.msra.mxu0 %v2810_v23  ;;  %1141 = vmatpush1.msra.mxu1 %v2811_v24  ;;  %v1286_v23 = vld [vmem:[%s2711_s3 + $0x1b0] sm:$0xff]  ;;  %v1281_v24 = vld [vmem:[%s2711_s3 + $0x188] sm:$0xff] }
 0x156   : > { %1071 = vmatprep.subr.mxu0 %v2812_v25  ;;  %1142 = vmatprep.subr.mxu1 %v2813_v26  ;;  %v1283_v25 = vld [vmem:[%s2711_s3 + $0x198] sm:$0xff]  ;;  %v1280_v26 = vld [vmem:[%s2711_s3 + $0x180] sm:$0xff] }
 0x157   : > { %1072 = vmatpush1.msra.mxu0 %v2814_v27  ;;  %1143 = vmatpush1.msra.mxu1 %v2815_v28  ;;  %v1282_v27 = vld [vmem:[%s2711_s3 + $0x190] sm:$0xff]  ;;  %v1277_v28 = vld [vmem:[%s2711_s3 + $0x168] sm:$0xff] }
 0x158   : > { %1073 = vmatprep.subr.mxu0 %v2816_v29  ;;  %1144 = vmatprep.subr.mxu1 %v2817_v30  ;;  %v1279_v29 = vld [vmem:[%s2711_s3 + $0x178] sm:$0xff]  ;;  %v1276_v30 = vld [vmem:[%s2711_s3 + $0x160] sm:$0xff] }
 0x159   : > { %1074 = vmatpush1.msra.mxu0 %v2818_v31  ;;  %1107 = vmatprep.mubr.f32.mxu0 %v2819_v32  ;;  %v1278_v31 = vld [vmem:[%s2711_s3 + $0x170] sm:$0xff] }
 0x15a   : > { %1145 = vmatpush1.msra.mxu1 %v2820_v33  ;;  %1178 = vmatprep.mubr.f32.mxu1 %v2819_v32  ;;  %v1275_v33 = vld [vmem:[%s2711_s3 + $0x158] sm:$0xff] }
 0x15b   : > { %1219 = vperm.xlu1 %1695, %v1217_v37   ;;  %1367 = vmatprep.subr.mxu1 %v1295_v14  ;;  %v1274_v37 = vld [vmem:[%s2711_s3 + $0x150] sm:$0xff]  ;;  %v1235_v14 = vld [vmem:[%s2711_s3 + $0x18] sm:$0xff] }
 0x1fa   : > { %v856_v38 = vpop.f32.mrf.mxu0  ;;  %v927_v5 = vpop.f32.mrf.mxu1 }
 0x1fb   : > { %v932_v40 = vadd.f32 %v856_v38, %v2823_v39  ;;  %v934_v62 = vadd.f32 %v927_v5, %v2825_v56  ;;  %v1269_v38 = vld [vmem:[%s2711_s3 + $0x128] sm:$0xff]  ;;  %v1271_v39 = vld [vmem:[%s2711_s3 + $0x138] sm:$0xff]  ;;  %v1262_v56 = vld [vmem:[%s2711_s3 + $0xf0] sm:$0xff] }
 0x1fc   : > { %v858_v41 = vpop.f32.mrf.mxu0  ;;  %v929_v63 = vpop.f32.mrf.mxu1  ;;  %v1263_v5 = vld [vmem:[%s2711_s3 + $0xf8] sm:$0xff] }
 0x1fd   : > { %v936_v43 = vsub.f32 0.0, %v932_v40  ;;  %v933_v45 = vadd.f32 %v858_v41, %v2824_v44  ;;  %v938_v0 = vsub.f32 0.0, %v934_v62  ;;  %v935_v3 = vadd.f32 %v929_v63, %v2826_v4  ;;  %v1268_v40 = vld [vmem:[%s2711_s3 + $0x120] sm:$0xff]  ;;  %v1270_v41 = vld [vmem:[%s2711_s3 + $0x130] sm:$0xff]  ;;  %v1267_v44 = vld [vmem:[%s2711_s3 + $0x118] sm:$0xff] }
 0x1fe   : > { %v1257_v62 = vld [vmem:[%s2711_s3 + $0xc8] sm:$0xff]  ;;  %v1256_v63 = vld [vmem:[%s2711_s3 + $0xc0] sm:$0xff]  ;;  %v1258_v4 = vld [vmem:[%s2711_s3 + $0xd0] sm:$0xff] }
 0x1ff   : > { %v939_v46 = vmul.f32 1.442695, %v936_v43  ;;  %v937_v47 = vsub.f32 0.0, %v933_v45  ;;  %v943_v54 = vmul.f32 1.442695, %v938_v0  ;;  %v1265_v43 = vld [vmem:[%s2711_s3 + $0x108] sm:$0xff] }
 0x200   : > { %v1264_v45 = vld [vmem:[%s2711_s3 + $0x100] sm:$0xff]  ;;  %v1259_v0 = vld [vmem:[%s2711_s3 + $0xd8] sm:$0xff] }
 0x201   : > { %1720 = vpow2.f32 %v939_v46  ;;  %v941_v6 = vmul.f32 1.442695, %v937_v47  ;;  %v1266_v46 = vld [vmem:[%s2711_s3 + $0x110] sm:$0xff]  ;;  %v1261_v47 = vld [vmem:[%s2711_s3 + $0xe8] sm:$0xff] }
 0x203   : > { %1722 = vpow2.f32 %v941_v6  ;;  %v1260_v6 = vld [vmem:[%s2711_s3 + $0xe0] sm:$0xff] }
 0x204   : > { %1724 = vtanh.f32 %v935_v3  ;;  %v1253_v3 = vld [vmem:[%s2711_s3 + $0xa8] sm:$0xff] }
 0x205   : > { %1726 = vpow2.f32 %v943_v54  ;;  %v1255_v54 = vld [vmem:[%s2711_s3 + $0xb8] sm:$0xff] }
 0x20e   : > { %v1721_v51 = vpop.eup %1720 }
 0x20f   : > { %v945_v58 = vadd.f32 1.0, %v1721_v51  ;;  %v1252_v51 = vld [vmem:[%s2711_s3 + $0xa0] sm:$0xff] }
 0x210   : > { %v1723_v60 = vpop.eup %1722 }
 0x211   : > { %1728 = vrcp.f32 %v945_v58  ;;  %v946_v61 = vadd.f32 1.0, %v1723_v60  ;;  %v1725_v50 = vpop.eup %1724  ;;  %v1254_v58 = vld [vmem:[%s2711_s3 + $0xb0] sm:$0xff]  ;;  %v1249_v60 = vld [vmem:[%s2711_s3 + $0x88] sm:$0xff] }
 0x212   : > { %v1727_v53 = vpop.eup %1726 }
 0x213   : > { %1730 = vrcp.f32 %v946_v61  ;;  %v947_v7 = vadd.f32 1.0, %v1727_v53  ;;  %v1251_v61 = vld [vmem:[%s2711_s3 + $0x98] sm:$0xff]  ;;  %v1250_v53 = vld [vmem:[%s2711_s3 + $0x90] sm:$0xff] }
 0x215   : > { %1732 = vrcp.f32 %v947_v7  ;;  %v1246_v7 = vld [vmem:[%s2711_s3 + $0x70] sm:$0xff] }
 0x21e   : > { %v1729_v57 = vpop.eup %1728 }
 0x21f   : > { %v954_v42 = vmul.f32 %v1729_v57, %v1725_v50  ;;  %v1248_v50 = vld [vmem:[%s2711_s3 + $0x80] sm:$0xff]  ;;  %v1245_v57 = vld [vmem:[%s2711_s3 + $0x68] sm:$0xff] }
 0x220   : > { %v1731_v49 = vpop.eup %1730 }
 0x221   : > { %v953_v8 = vmul.f32 %v1731_v49, %v2358_v1  ;;  %v1293_v1 = vld [vmem:[%s2711_s3 + $0x1e8] sm:$0xff]  ;;  %v1244_v49 = vld [vmem:[%s2711_s3 + $0x60] sm:$0xff] }
 0x222   : > { %v1733_v52 = vpop.eup %1732  ;;  %1296 = vmatprep.subr.mxu0 %v1293_v1  ;;  %v1233_v1 = vld [vmem:[%s2711_s3 + $0x8] sm:$0xff] }
 0x223   : > { %v2437_v2 = vadd.f32 %v954_v42, %v953_v8  ;;  %v1247_v42 = vld [vmem:[%s2711_s3 + $0x78] sm:$0xff]  ;;  %v1241_v8 = vld [vmem:[%s2711_s3 + $0x48] sm:$0xff] }
 0x225   : > { %1734 = vtanh.f32 %v2437_v2 }
 0x232   : > { %v1735_v10 = vpop.eup %1734 }
 0x233   : > { %v957_v11 = vmul.f32 %v1735_v10, %v1733_v52  ;;  %v1242_v52 = vld [vmem:[%s2711_s3 + $0x50] sm:$0xff]  ;;  %v1239_v10 = vld [vmem:[%s2711_s3 + $0x38] sm:$0xff] }
 0x235   : > { %v2441_v13 = vsel %vm968_vm5, %v957_v11, %v716_v12  ;;  %1108 = vmatmul.mubr.f32.vlgmr.msra.gmra.mxu0 %v957_v11  ;;  %1179 = vmatmul.mubr.f32.vlgmr.msra.gmra.mxu1 %v957_v11  ;;  %v1236_v11 = vld [vmem:[%s2711_s3 + $0x20] sm:$0xff]  ;;  %v1238_v12 = vld [vmem:[%s2711_s3 + $0x30] sm:$0xff] }
 0x236   : > { %1360 = vmatprep.mubr.f32.mxu0 %v2819_v32  ;;  %1431 = vmatprep.mubr.f32.mxu1 %v2819_v32  ;;  %v1273_v32 = vld [vmem:[%s2711_s3 + $0x148] sm:$0xff] }
 0x237   : > { %1297 = vmatpush1.msra.mxu0 %v1292_v59  ;;  %1368 = vmatpush1.msra.mxu1 %v1294_v15  ;;  %v1232_v59 = vld [vmem:[%s2711_s3] sm:$0xff]  ;;  %v1234_v15 = vld [vmem:[%s2711_s3 + $0x10] sm:$0xff] }
 0x238   : > { %1298 = vmatprep.subr.mxu0 %v1289_v16  ;;  %1369 = vmatprep.subr.mxu1 %v1291_v17  ;;  %v1467_v16 = vstv %s1466_s23 }
 0x239   : > { %1299 = vmatpush1.msra.mxu0 %v1288_v18  ;;  %1370 = vmatpush1.msra.mxu1 %v1290_v19  ;;  %vm1468_vm6 = vcmp.eq.s32.totalorder %v1467_v16, %v2821_v35  ;;  %v2827_v19 = vld [vmem:[#allocation35_spill] sm:$0xff] }
 0x23a   : > { %1300 = vmatprep.subr.mxu0 %v1285_v20  ;;  %1371 = vmatprep.subr.mxu1 %v1287_v21  ;;  %v1470_v17 = vsel %vm1468_vm6, 1, %v2822_v36 }
 0x23b   : > { %1301 = vmatpush1.msra.mxu0 %v1284_v22  ;;  %1372 = vmatpush1.msra.mxu1 %v1286_v23  ;;  %v2828_v23 = vld [vmem:[#allocation36_spill] sm:$0xff] }
 0x23c   : > { %1302 = vmatprep.subr.mxu0 %v1281_v24  ;;  %1373 = vmatprep.subr.mxu1 %v1283_v25 }
 0x23d   : > { %1303 = vmatpush1.msra.mxu0 %v1280_v26  ;;  %1374 = vmatpush1.msra.mxu1 %v1282_v27 }
 0x23e   : > { %1304 = vmatprep.subr.mxu0 %v1277_v28  ;;  %1375 = vmatprep.subr.mxu1 %v1279_v29  ;;  %v2829_v29 = vld [vmem:[#allocation39_spill] sm:$0xff] }
 0x23f   : > { %1305 = vmatpush1.msra.mxu0 %v1276_v30  ;;  %1376 = vmatpush1.msra.mxu1 %v1278_v31 }
 0x240   : > { %1306 = vmatprep.subr.mxu0 %v1273_v32  ;;  %1377 = vmatprep.subr.mxu1 %v1275_v33  ;;  %v2830_v32 = vld [vmem:[#allocation40_spill] sm:$0xff] }
 0x241   : > { %1307 = vmatpush1.msra.mxu0 %v1272_v34  ;;  %1378 = vmatpush1.msra.mxu1 %v1274_v37 }
 0x242   : > { %1308 = vmatprep.subr.mxu0 %v1269_v38  ;;  %1379 = vmatprep.subr.mxu1 %v1271_v39 }
 0x243   : > { %1309 = vmatpush1.msra.mxu0 %v1268_v40  ;;  %1380 = vmatpush1.msra.mxu1 %v1270_v41 }
 0x244   : > { %1310 = vmatprep.subr.mxu0 %v1265_v43  ;;  %1381 = vmatprep.subr.mxu1 %v1267_v44 }
 0x245   : > { %1311 = vmatpush1.msra.mxu0 %v1264_v45  ;;  %1382 = vmatpush1.msra.mxu1 %v1266_v46 }
 0x246   : > { %1312 = vmatprep.subr.mxu0 %v1261_v47  ;;  %1383 = vmatprep.subr.mxu1 %v1263_v5 }
 0x247   : > { %1313 = vmatpush1.msra.mxu0 %v1260_v6  ;;  %1384 = vmatpush1.msra.mxu1 %v1262_v56  ;;  %v1220_v6 = vpop.permute.xlu1 %1219 }
 0x248   : > { %1314 = vmatprep.subr.mxu0 %v1257_v62  ;;  %1385 = vmatprep.subr.mxu1 %v1259_v0  ;;  %vm1221_vm7 = vcmp.eq.s32.totalorder %v1220_v6, 1 }
 0x249   : > { %1315 = vmatpush1.msra.mxu0 %v1256_v63  ;;  %1386 = vmatpush1.msra.mxu1 %v1258_v4 }
 0x24a   : > { %1316 = vmatprep.subr.mxu0 %v1253_v3  ;;  %1387 = vmatprep.subr.mxu1 %v1255_v54  ;;  %v2831_v3 = vld [vmem:[#allocation37_spill] sm:$0xff] }
 0x24b   : > { %1317 = vmatpush1.msra.mxu0 %v1252_v51  ;;  %1388 = vmatpush1.msra.mxu1 %v1254_v58 }
 0x24c   : > { %1318 = vmatprep.subr.mxu0 %v1249_v60  ;;  %1389 = vmatprep.subr.mxu1 %v1251_v61  ;;  %v2832_v60 = vld [vmem:[#allocation38_spill] sm:$0xff] }
 0x24d   : > { %1319 = vmatpush1.msra.mxu0 %v1248_v50  ;;  %1390 = vmatpush1.msra.mxu1 %v1250_v53 }
 0x24e   : > { %1320 = vmatprep.subr.mxu0 %v1245_v57  ;;  %1391 = vmatprep.subr.mxu1 %v1247_v42  ;;  %v2833_v42 = vld [vmem:[#allocation41_spill] sm:$0xff] }
 0x24f   : > { %1321 = vmatpush1.msra.mxu0 %v1244_v49  ;;  %1392 = vmatpush1.msra.mxu1 %v1246_v7 }
 0x250   : > { %1322 = vmatprep.subr.mxu0 %v1241_v8  ;;  %1393 = vmatprep.subr.mxu1 %v1243_v55 }
 0x251   : > { %1323 = vmatpush1.msra.mxu0 %v1240_v48  ;;  %1394 = vmatpush1.msra.mxu1 %v1242_v52 }
 0x252   : > { %1324 = vmatprep.subr.mxu0 %v1237_v9  ;;  %1395 = vmatprep.subr.mxu1 %v1239_v10 }
 0x253   : > { %1325 = vmatpush1.msra.mxu0 %v1236_v11  ;;  %1396 = vmatpush1.msra.mxu1 %v1238_v12 }
 0x254   : > { %1326 = vmatprep.subr.mxu0 %v1233_v1  ;;  %1397 = vmatprep.subr.mxu1 %v1235_v14 }
 0x255   : > { %1327 = vmatpush1.msra.mxu0 %v1232_v59  ;;  %1398 = vmatpush1.msra.mxu1 %v1234_v15 }
 0x256   : > { %1472 = vperm.xlu1 %1695, %v1470_v17  }
 0x2f5   : > { %v1109_v18 = vpop.f32.mrf.mxu0  ;;  %v1180_v27 = vpop.f32.mrf.mxu1 }
 0x2f6   : > { %v1185_v20 = vadd.f32 %v1109_v18, %v2827_v19  ;;  %v1187_v30 = vadd.f32 %v1180_v27, %v2829_v29 }
 0x2f7   : > { %v1111_v21 = vpop.f32.mrf.mxu0  ;;  %v1182_v35 = vpop.f32.mrf.mxu1 }
 0x2f8   : > { %v1189_v22 = vsub.f32 0.0, %v1185_v20  ;;  %v1186_v24 = vadd.f32 %v1111_v21, %v2828_v23  ;;  %v1191_v31 = vsub.f32 0.0, %v1187_v30  ;;  %v1188_v36 = vadd.f32 %v1182_v35, %v2830_v32  ;;  %v1473_v20 = vpop.permute.xlu1 %1472 }
 0x2f9   : > { %vm1474_vm8 = vcmp.eq.s32.totalorder %v1473_v20, 1 }
 0x2fa   : > { %v1192_v25 = vmul.f32 1.442695, %v1189_v22  ;;  %v1190_v26 = vsub.f32 0.0, %v1186_v24  ;;  %v1196_v33 = vmul.f32 1.442695, %v1191_v31 }
 0x2fc   : > { %1736 = vpow2.f32 %v1192_v25  ;;  %v1194_v28 = vmul.f32 1.442695, %v1190_v26 }
 0x2fe   : > { %1738 = vpow2.f32 %v1194_v28 }
 0x2ff   : > { %1740 = vtanh.f32 %v1188_v36 }
 0x300   : > { %1742 = vpow2.f32 %v1196_v33 }
 0x309   : > { %v1737_v34 = vpop.eup %1736 }
 0x30a   : > { %v1198_v37 = vadd.f32 1.0, %v1737_v34 }
 0x30b   : > { %v1739_v38 = vpop.eup %1738 }
 0x30c   : > { %1744 = vrcp.f32 %v1198_v37  ;;  %v1199_v39 = vadd.f32 1.0, %v1739_v38  ;;  %v1741_v40 = vpop.eup %1740 }
 0x30d   : > { %v1743_v41 = vpop.eup %1742 }
 0x30e   : > { %1746 = vrcp.f32 %v1199_v39  ;;  %v1200_v46 = vadd.f32 1.0, %v1743_v41 }
 0x310   : > { %1748 = vrcp.f32 %v1200_v46 }
 0x319   : > { %v1745_v43 = vpop.eup %1744 }
 0x31a   : > { %v1207_v44 = vmul.f32 %v1745_v43, %v1741_v40 }
 0x31b   : > { %v1747_v45 = vpop.eup %1746 }
 0x31c   : > { %v1206_v47 = vmul.f32 %v1747_v45, %v2437_v2 }
 0x31d   : > { %v1749_v56 = vpop.eup %1748 }
 0x31e   : > { %v1208_v5 = vadd.f32 %v1207_v44, %v1206_v47 }
 0x320   : > { %1750 = vtanh.f32 %v1208_v5 }
 0x32d   : > { %v1751_v62 = vpop.eup %1750 }
 0x32e   : > { %v1210_v0 = vmul.f32 %v1751_v62, %v1749_v56 }
 0x330   : > { %v1222_v63 = vsel %vm1221_vm7, %v1210_v0, %v2441_v13  ;;  %1361 = vmatmul.mubr.f32.vlgmr.msra.gmra.mxu0 %v1210_v0  ;;  %1432 = vmatmul.mubr.f32.vlgmr.msra.gmra.mxu1 %v1210_v0  ;;  %v2834_v13 = vld [vmem:[#allocation42_spill] sm:$0xff] }
 0x3f0   : > { %v1362_v4 = vpop.f32.mrf.mxu0  ;;  %v1433_v53 = vpop.f32.mrf.mxu1 }
 0x3f1   : > { %v1438_v54 = vadd.f32 %v1362_v4, %v2831_v3  ;;  %v1440_v49 = vadd.f32 %v1433_v53, %v2833_v42 }
 0x3f2   : > { %v1364_v51 = vpop.f32.mrf.mxu0  ;;  %v1435_v8 = vpop.f32.mrf.mxu1 }
 0x3f3   : > { %v1442_v58 = vsub.f32 0.0, %v1438_v54  ;;  %v1439_v61 = vadd.f32 %v1364_v51, %v2832_v60  ;;  %v1444_v7 = vsub.f32 0.0, %v1440_v49  ;;  %v1441_v55 = vadd.f32 %v1435_v8, %v2834_v13 }
 0x3f5   : > { %v1445_v2 = vmul.f32 1.442695, %v1442_v58  ;;  %v1443_v50 = vsub.f32 0.0, %v1439_v61  ;;  %v1449_v48 = vmul.f32 1.442695, %v1444_v7 }
 0x3f7   : > { %1752 = vpow2.f32 %v1445_v2  ;;  %v1447_v57 = vmul.f32 1.442695, %v1443_v50 }
 0x3f9   : > { %1754 = vpow2.f32 %v1447_v57 }
 0x3fa   : > { %1756 = vtanh.f32 %v1441_v55 }
 0x3fb   : > { %1758 = vpow2.f32 %v1449_v48 }
 0x404   : > { %v1753_v52 = vpop.eup %1752 }
 0x405   : > { %v1451_v9 = vadd.f32 1.0, %v1753_v52 }
 0x406   : > { %v1755_v10 = vpop.eup %1754 }
 0x407   : > { %1760 = vrcp.f32 %v1451_v9  ;;  %v1452_v11 = vadd.f32 1.0, %v1755_v10  ;;  %v1757_v12 = vpop.eup %1756 }
 0x408   : > { %v1759_v1 = vpop.eup %1758 }
 0x409   : > { %1762 = vrcp.f32 %v1452_v11  ;;  %v1453_v16 = vadd.f32 1.0, %v1759_v1 }
 0x40b   : > { %1764 = vrcp.f32 %v1453_v16 }
 0x414   : > { %v1761_v14 = vpop.eup %1760 }
 0x415   : > { %v1460_v59 = vmul.f32 %v1761_v14, %v1757_v12 }
 0x416   : > { %v1763_v15 = vpop.eup %1762 }
 0x417   : > { %v1459_v17 = vmul.f32 %v1763_v15, %v1208_v5 }
 0x418   : > { %v1765_v19 = vpop.eup %1764 }
 0x419   : > { %v1461_v18 = vadd.f32 %v1460_v59, %v1459_v17 }
 0x41b   : > { %1766 = vtanh.f32 %v1461_v18  ;;  %1465 = vst [vmem:[#allocation4] sm:$0xff] %v1461_v18 }
 0x428   : > { %v1767_v21 = vpop.eup %1766  ;;  %1480 = sbr.rel (%p1625_p5) target bundleno = 1298 (0x512), region = 56 }
 0x429   : > { %v1463_v22 = vmul.f32 %v1767_v21, %v1765_v19 }
 0x42b   : > { %1464 = vst [vmem:[#allocation3] sm:$0xff] %v1463_v22  ;;  %v1475_v23 = vsel %vm1474_vm8, %v1463_v22, %v1222_v63 }
 0x42c   : > { %1476 = vst [vmem:[#allocation5] sm:$0xff] %v1475_v23 }
 0x42d   : > { %v1497_v24 = vld [vmem:[%s2713_s5 + $0x78] sm:$0xff]  ;;  %v1779_v25 = vmov 0.0   ;;  %v1496_v26 = vld [vmem:[%s2713_s5 + $0x70] sm:$0xff]  ;;  %vm1780_vm9 = vmmov 0   ;;  %v1495_v27 = vld [vmem:[%s2713_s5 + $0x68] sm:$0xff] }
 0x42e   : > { %1646 = vmatprep.subr.mxu0 %v1779_v25  ;;  %1678 = vmatprep.mubr.msk.f32.mxu0 %vm1780_vm9, %v1779_v25  ;;  %v1494_v28 = vld [vmem:[%s2713_s5 + $0x60] sm:$0xff]  ;;  %v1493_v29 = vld [vmem:[%s2713_s5 + $0x58] sm:$0xff]  ;;  %v1492_v30 = vld [vmem:[%s2713_s5 + $0x50] sm:$0xff] }
 0x42f   : > { %1647 = vmatpush3.msra.mxu0 %v1497_v24  ;;  %v1491_v31 = vld [vmem:[%s2713_s5 + $0x48] sm:$0xff]  ;;  %v1490_v35 = vld [vmem:[%s2713_s5 + $0x40] sm:$0xff]  ;;  %v1489_v32 = vld [vmem:[%s2713_s5 + $0x38] sm:$0xff] }
 0x430   : > { %1648 = vmatprep.subr.mxu0 %v1779_v25  ;;  %v1488_v36 = vld [vmem:[%s2713_s5 + $0x30] sm:$0xff]  ;;  %v1487_v33 = vld [vmem:[%s2713_s5 + $0x28] sm:$0xff]  ;;  %v1486_v34 = vld [vmem:[%s2713_s5 + $0x20] sm:$0xff] }
 0x431   : > { %1649 = vmatpush3.msra.mxu0 %v1496_v26  ;;  %v1485_v37 = vld [vmem:[%s2713_s5 + $0x18] sm:$0xff]  ;;  %v1484_v38 = vld [vmem:[%s2713_s5 + $0x10] sm:$0xff]  ;;  %v1483_v39 = vld [vmem:[%s2713_s5 + $0x8] sm:$0xff] }
 0x432   : > { %1650 = vmatprep.subr.mxu0 %v1779_v25  ;;  %v1482_v40 = vld [vmem:[%s2713_s5] sm:$0xff] }
 0x433   : > { %1651 = vmatpush3.msra.mxu0 %v1495_v27  ;;  %v1481_v41 = vld [vmem:[#allocation5] sm:$0xff]  ;;  %v1626_v43 = vld [vmem:[%s2714_s6] ss:$0 sm:$0xff] }
 0x434   : > { %1652 = vmatprep.subr.mxu0 %v1779_v25 }
 0x435   : > { %1653 = vmatpush3.msra.mxu0 %v1494_v28 }
 0x436   : > { %1654 = vmatprep.subr.mxu0 %v1779_v25 }
 0x437   : > { %1655 = vmatpush3.msra.mxu0 %v1493_v29 }
 0x438   : > { %1656 = vmatprep.subr.mxu0 %v1779_v25 }
 0x439   : > { %1657 = vmatpush3.msra.mxu0 %v1492_v30 }
 0x43a   : > { %1658 = vmatprep.subr.mxu0 %v1779_v25 }
 0x43b   : > { %1659 = vmatpush3.msra.mxu0 %v1491_v31 }
 0x43c   : > { %1660 = vmatprep.subr.mxu0 %v1779_v25 }
 0x43d   : > { %1661 = vmatpush3.msra.mxu0 %v1490_v35 }
 0x43e   : > { %1662 = vmatprep.subr.mxu0 %v1779_v25 }
 0x43f   : > { %1663 = vmatpush3.msra.mxu0 %v1489_v32 }
 0x440   : > { %1664 = vmatprep.subr.mxu0 %v1779_v25 }
 0x441   : > { %1665 = vmatpush3.msra.mxu0 %v1488_v36 }
 0x442   : > { %1666 = vmatprep.subr.mxu0 %v1779_v25 }
 0x443   : > { %1667 = vmatpush3.msra.mxu0 %v1487_v33 }
 0x444   : > { %1668 = vmatprep.subr.mxu0 %v1779_v25 }
 0x445   : > { %1669 = vmatpush3.msra.mxu0 %v1486_v34 }
 0x446   : > { %1670 = vmatprep.subr.mxu0 %v1779_v25 }
 0x447   : > { %1671 = vmatpush3.msra.mxu0 %v1485_v37 }
 0x448   : > { %1672 = vmatprep.subr.mxu0 %v1779_v25 }
 0x449   : > { %1673 = vmatpush3.msra.mxu0 %v1484_v38 }
 0x44a   : > { %1674 = vmatprep.subr.mxu0 %v1779_v25 }
 0x44b   : > { %1675 = vmatpush3.msra.mxu0 %v1483_v39 }
 0x44c   : > { %1676 = vmatprep.subr.mxu0 %v1779_v25 }
 0x44d   : > { %1677 = vmatpush3.msra.mxu0 %v1482_v40 }
 0x44e   : > { %1679 = vmatmul.mubr.f32.vlgmr.msra.gmra.mxu0 %v1481_v41 }
 0x50e   : > { %v1571_v44 = vpop.f32.mrf.mxu0 }
 0x50f   : > { %v1572_v45 = vadd.f32 %v1626_v43, %v1571_v44 }
 0x510   : > { %v1680_v46 = vpop.f32.mrf.mxu0 }
 0x511   : > { %1575 = vst [vmem:[%s2715_s7] sm:$0xff] %v1572_v45 }
 0x512 PF: > { %s17_s24 = sadd.s32 1, %s1774_s24  }
 0x513   : > { %p14_p6 = scmp.ge.s32.totalorder %s17_s24, 4  }
 0x515   :  { %16 = sbr.rel (!%p14_p6) target bundleno = 1 (0x1), region = 86 }

</bundles_post_ra>
